<compile_context>
chip_gen: v6e
topology: v6e:2x2x1
jax: 0.10.0
libtpu: 0.0.40
codegen_flags: <defaults>
</compile_context>

<pallas_src>
import functools

import jax
import jax.numpy as jnp
from jax import lax
from jax.experimental import pallas as pl
from jax.experimental.pallas import tpu as pltpu

LANE = 128
SUBLANE = 8


def _round_up(x, m):
    return ((x + m - 1) // m) * m


def _feature_pad(d):
    # v6e/v7x MXUs are 256 wide: pad K/N to 256 once the true dim is large enough
    # to benefit. Small dims (and v5e's 128x128 MXU) stay at 128 to avoid waste.
    return _round_up(d, 256) if d >= 192 else _round_up(d, LANE)


def mlp_kernel(x_ref, *refs, n_hidden_layers, out_dim):
    """Fused MLP forward for one batch tile.

    refs = (w0, b0, w1, b1, ..., wL, bL, out_ref); layers 0..L-1 are hidden (ReLU)
    layers, layer L is the output head. Weights are bf16 (in_pad, out_pad), biases
    f32 (1, out_pad). All padded lanes carry zero weights/biases.
    """
    out_ref = refs[-1]
    param_refs = refs[:-1]

    h = x_ref[...]  # bf16 (TB, d_in_pad)

    # Hidden layers: bf16 matmul on the MXU with f32 accumulate, bias/ReLU in f32.
    for i in range(n_hidden_layers):
        w = param_refs[2 * i][...]
        b = param_refs[2 * i + 1][...]
        acc = jnp.dot(h, w, preferred_element_type=jnp.float32) + b
        h = jnp.maximum(acc, 0.0).astype(jnp.bfloat16)

    # Output head.
    w = param_refs[-2][...]
    b = param_refs[-1][...]
    logits = jnp.dot(h, w, preferred_element_type=jnp.float32) + b  # f32 (TB, d_out_pad)

    if out_dim == 1:
        # Exact sigmoid (final probabilities). Padded lanes evaluate to 0.5 but are
        # sliced away outside the kernel.
        out = 1.0 / (1.0 + jnp.exp(-logits))
    else:
        # Numerically-stable softmax over the *valid* lanes only (padded lanes -> -inf).
        lane_ids = lax.broadcasted_iota(jnp.int32, logits.shape, 1)
        masked = jnp.where(lane_ids < out_dim, logits, -1e30)
        m = jnp.max(masked, axis=-1, keepdims=True)
        e = jnp.exp(masked - m)
        # Exact division for the final normalization so rows sum to 1 (up to output
        # dtype rounding); approx reciprocal would inject ~1e-3 relative error.
        out = e / jnp.sum(e, axis=-1, keepdims=True)

    out_ref[...] = out.astype(out_ref.dtype)


def mlp_forward(x, params, out_dim):
    """x: (B, input_dim) f32. params: flat [w0, b0, ..., wL, bL], w_i (in, out) f32,
    b_i (1, out) f32 (torch layout transposed)."""
    B, d_in = x.shape
    n_linear = len(params) // 2
    n_hidden_layers = n_linear - 1

    # ---- pad feature dims; weights -> bf16, biases stay f32 ----
    padded_params = []
    param_bytes = 0
    for i in range(n_linear):
        w = params[2 * i]
        b = params[2 * i + 1]
        kp = _feature_pad(w.shape[0])
        np_ = _feature_pad(w.shape[1])
        w_p = jnp.zeros((kp, np_), jnp.bfloat16).at[: w.shape[0], : w.shape[1]].set(
            w.astype(jnp.bfloat16)
        )
        b_p = jnp.zeros((1, np_), jnp.float32).at[:, : b.shape[1]].set(b)
        padded_params += [w_p, b_p]
        param_bytes += w_p.size * 2 + b_p.size * 4

    d_in_pad = _feature_pad(d_in)
    d_out_pad = _feature_pad(out_dim)

    # TODO(synk): on v5e/v6e an int8-weight path (per-channel scales applied in the
    # f32 epilogue) would halve weight VMEM/DMA bytes and ~2x MXU throughput; not
    # portable to v7x (fp8-only MXU), so it must be gated per chip.

    # ---- batch tiling ----
    # Large tiles amortize the ~0.35us per-grid-step overhead (cap at 512 rows);
    # keep >= 2 grid steps when the batch allows so the "parallel" axis can split
    # across v7x's two TensorCores (costs at most one extra tiny step on 1-TC chips).
    n_tiles = max(1, -(-B // 512))
    if n_tiles < 2 and B > SUBLANE:
        n_tiles = 2
    tb = _round_up(-(-B // n_tiles), SUBLANE)
    b_pad = n_tiles * tb
    grid = (n_tiles,)

    # TODO(synk): at tiny shapes the separate XLA pad + f32->bf16 cast of x is an
    # extra HBM round trip the kernel could absorb (read the f32 block, cast on VPU).
    x_p = jnp.zeros((b_pad, d_in_pad), jnp.bfloat16).at[:B, :d_in].set(
        x.astype(jnp.bfloat16)
    )

    # ---- VMEM budget: 1x resident params + double-buffered x/out tiles + headroom ----
    act_width = max(
        d_in_pad, d_out_pad, *(padded_params[2 * i].shape[1] for i in range(n_linear))
    )
    vmem_need = (
        param_bytes                      # single-buffered, VMEM-resident params
        + 2 * tb * d_in_pad * 2          # double-buffered x tile (bf16)
        + 2 * tb * d_out_pad * 2         # double-buffered out tile (bf16)
        + 4 * tb * act_width * 4         # headroom for f32 intermediates / spill
    )
    try:
        phys_vmem = pltpu.get_tpu_info().vmem_capacity_bytes
    except Exception:
        phys_vmem = 64 * 1024 * 1024     # v7x per-TC floor
    vmem_limit = int(min(0.75 * phys_vmem, max(8 * 1024 * 1024, 2 * vmem_need)))
    # TODO(synk): if param_bytes grows past ~1/3 of physical VMEM (deep/wide MLPs),
    # switch to a K/N-tiled path ('arbitrary' reduction grid axis + f32 VMEM
    # accumulator) instead of keeping every layer's weights resident.

    # Advisory cost estimate for XLA scheduling around the custom call.
    flops = sum(
        2 * b_pad * padded_params[2 * i].shape[0] * padded_params[2 * i].shape[1]
        for i in range(n_linear)
    )
    cost = pl.CostEstimate(
        flops=flops,
        transcendentals=b_pad * d_out_pad,
        bytes_accessed=param_bytes + x_p.size * 2 + b_pad * d_out_pad * 2,
    )

    kernel = functools.partial(
        mlp_kernel, n_hidden_layers=n_hidden_layers, out_dim=out_dim
    )
    out_shape = jax.ShapeDtypeStruct((b_pad, d_out_pad), jnp.bfloat16)
    out_specs = pl.BlockSpec((tb, d_out_pad), lambda i: (i, 0))

    def call(param_pipeline_mode):
        in_specs = [pl.BlockSpec((tb, d_in_pad), lambda i: (i, 0))]
        for p in padded_params:
            # Constant index_map -> params are DMA'd once and stay VMEM-resident
            # across batch tiles; single-buffering avoids paying for a 2nd copy.
            in_specs.append(
                pl.BlockSpec(p.shape, lambda i: (0, 0), pipeline_mode=param_pipeline_mode)
            )
        return pl.pallas_call(
            kernel,
            grid=grid,
            in_specs=in_specs,
            out_specs=out_specs,
            out_shape=out_shape,
            compiler_params=pltpu.CompilerParams(
                dimension_semantics=("parallel",),  # independent batch tiles
                vmem_limit_bytes=vmem_limit,
            ),
            cost_estimate=cost,
        )(x_p, *padded_params)

    try:
        out_padded = call(pl.Buffered(1))
    except Exception:
        # Fallback if this Pallas build rejects single-buffering on a top-level
        # BlockSpec; default double-buffering only costs extra (tiny) param VMEM here.
        out_padded = call(None)

    # Strip batch/lane padding and restore f32 outside the kernel.
    return out_padded[:B, :out_dim].astype(jnp.float32)


def init_params(key, input_dim, hidden_dim, output_dim, n_layers):
    """Deterministic init mimicking torch.nn.Linear's U(-1/sqrt(fan_in), 1/sqrt(fan_in))."""
    dims = [input_dim] + [hidden_dim] * n_layers + [output_dim]
    params = []
    for i in range(len(dims) - 1):
        d_in, d_out = dims[i], dims[i + 1]
        key, kw, kb = jax.random.split(key, 3)
        bound = 1.0 / (d_in ** 0.5)
        w = jax.random.uniform(kw, (d_in, d_out), jnp.float32, -bound, bound)
        b = jax.random.uniform(kb, (1, d_out), jnp.float32, -bound, bound)
        params += [w, b]
    return params


def mlp_reference(x, params, out_dim):
    """Pure-JAX reference (uses the same bf16-quantized weights, f32 math)."""
    n_hidden = len(params) // 2 - 1
    h = x.astype(jnp.float32)
    for i in range(n_hidden):
        w = params[2 * i].astype(jnp.bfloat16).astype(jnp.float32)
        h = jnp.maximum(h @ w + params[2 * i + 1], 0.0)
    w = params[-2].astype(jnp.bfloat16).astype(jnp.float32)
    logits = h @ w + params[-1]
    if out_dim == 1:
        return jax.nn.sigmoid(logits)
    return jax.nn.softmax(logits, axis=-1)


if __name__ == "__main__":
    # Small shapes consistent with the module's forward; batch large enough for
    # >=2 grid steps so pipelining / megacore actually engage.
    batch = 256
    input_dim = 32
    hidden_dim = 32
    output_dim = 4   # != 1 -> softmax head
    n_layers = 2

    key = jax.random.PRNGKey(0)
    key, kx = jax.random.split(key)
    x = jax.random.normal(kx, (batch, input_dim), jnp.float32)

    # Softmax head.
    params = init_params(key, input_dim, hidden_dim, output_dim, n_layers)
    out = jax.block_until_ready(mlp_forward(x, params, output_dim))
    ref = mlp_reference(x, params, output_dim)
    assert out.shape == (batch, output_dim)
    assert jnp.allclose(out, ref, atol=1e-2, rtol=1e-2), "softmax head mismatch vs reference"
    assert jnp.allclose(jnp.sum(out, axis=-1), 1.0, atol=5e-3), "softmax rows must sum to 1"

    # Sigmoid head (out_dim == 1 branch).
    params1 = init_params(jax.random.PRNGKey(1), input_dim, hidden_dim, 1, n_layers)
    out1 = jax.block_until_ready(mlp_forward(x, params1, 1))
    ref1 = mlp_reference(x, params1, 1)
    assert out1.shape == (batch, 1)
    assert jnp.allclose(out1, ref1, atol=1e-2, rtol=1e-2), "sigmoid head mismatch vs reference"

    print("KERNEL_OK")
</pallas_src>

<mosaic_0001>
module attributes {stable_mosaic.version = 11 : i64} {
  func.func @mlp_kernel(%arg0: i32, %arg1: memref<128x128xbf16, #tpu.memory_space<vmem>>, %arg2: memref<128x128xbf16, #tpu.memory_space<vmem>>, %arg3: memref<1x128xf32, #tpu.memory_space<vmem>>, %arg4: memref<128x128xbf16, #tpu.memory_space<vmem>>, %arg5: memref<1x128xf32, #tpu.memory_space<vmem>>, %arg6: memref<128x128xbf16, #tpu.memory_space<vmem>>, %arg7: memref<1x128xf32, #tpu.memory_space<vmem>>, %arg8: memref<128x128xbf16, #tpu.memory_space<vmem>>) attributes {dimension_semantics = [#tpu.dimension_semantics<parallel>], iteration_bounds = array<i64: 2>, scalar_prefetch = 0 : i64, scratch_operands = 0 : i64, tpu.core_type = #tpu.core_type<tc>, window_params = [{transform_indices = @transform_0, window_bounds = array<i64: 128, 128>}, {pipeline_mode = #tpu.pipeline_mode<synchronous>, transform_indices = @transform_1, window_bounds = array<i64: 128, 128>}, {pipeline_mode = #tpu.pipeline_mode<synchronous>, transform_indices = @transform_2, window_bounds = array<i64: 1, 128>}, {pipeline_mode = #tpu.pipeline_mode<synchronous>, transform_indices = @transform_3, window_bounds = array<i64: 128, 128>}, {pipeline_mode = #tpu.pipeline_mode<synchronous>, transform_indices = @transform_4, window_bounds = array<i64: 1, 128>}, {pipeline_mode = #tpu.pipeline_mode<synchronous>, transform_indices = @transform_5, window_bounds = array<i64: 128, 128>}, {pipeline_mode = #tpu.pipeline_mode<synchronous>, transform_indices = @transform_6, window_bounds = array<i64: 1, 128>}, {transform_indices = @transform_7, window_bounds = array<i64: 128, 128>}]} {
    %c0 = arith.constant 0 : index
    %c0_0 = arith.constant 0 : index
    %0 = vector.load %arg1[%c0, %c0_0] : memref<128x128xbf16, #tpu.memory_space<vmem>>, vector<128x128xbf16>
    %c0_1 = arith.constant 0 : index
    %c0_2 = arith.constant 0 : index
    %1 = vector.load %arg2[%c0_1, %c0_2] : memref<128x128xbf16, #tpu.memory_space<vmem>>, vector<128x128xbf16>
    %c0_3 = arith.constant 0 : index
    %c0_4 = arith.constant 0 : index
    %2 = vector.load %arg3[%c0_3, %c0_4] : memref<1x128xf32, #tpu.memory_space<vmem>>, vector<1x128xf32>
    %cst = arith.constant dense<0.000000e+00> : vector<128x128xf32>
    %3 = tpu.matmul %0, %1, %cst {dimension_numbers = #tpu.dot_dimension_numbers<[1], [0], [0], [1], [0, 0, 1, 1], [], []>} : vector<128x128xbf16>, vector<128x128xbf16>, vector<128x128xf32> -> vector<128x128xf32>
    %4 = vector.broadcast %2 : vector<1x128xf32> to vector<128x128xf32>
    %5 = arith.addf %3, %4 : vector<128x128xf32>
    %cst_5 = arith.constant 0.000000e+00 : f32
    %6 = vector.broadcast %cst_5 : f32 to vector<128x128xf32>
    %7 = arith.maximumf %5, %6 : vector<128x128xf32>
    %8 = arith.truncf %7 : vector<128x128xf32> to vector<128x128xbf16>
    %c0_6 = arith.constant 0 : index
    %c0_7 = arith.constant 0 : index
    %9 = vector.load %arg4[%c0_6, %c0_7] : memref<128x128xbf16, #tpu.memory_space<vmem>>, vector<128x128xbf16>
    %c0_8 = arith.constant 0 : index
    %c0_9 = arith.constant 0 : index
    %10 = vector.load %arg5[%c0_8, %c0_9] : memref<1x128xf32, #tpu.memory_space<vmem>>, vector<1x128xf32>
    %cst_10 = arith.constant dense<0.000000e+00> : vector<128x128xf32>
    %11 = tpu.matmul %8, %9, %cst_10 {dimension_numbers = #tpu.dot_dimension_numbers<[1], [0], [0], [1], [0, 0, 1, 1], [], []>} : vector<128x128xbf16>, vector<128x128xbf16>, vector<128x128xf32> -> vector<128x128xf32>
    %12 = vector.broadcast %10 : vector<1x128xf32> to vector<128x128xf32>
    %13 = arith.addf %11, %12 : vector<128x128xf32>
    %cst_11 = arith.constant 0.000000e+00 : f32
    %14 = vector.broadcast %cst_11 : f32 to vector<128x128xf32>
    %15 = arith.maximumf %13, %14 : vector<128x128xf32>
    %16 = arith.truncf %15 : vector<128x128xf32> to vector<128x128xbf16>
    %c0_12 = arith.constant 0 : index
    %c0_13 = arith.constant 0 : index
    %17 = vector.load %arg6[%c0_12, %c0_13] : memref<128x128xbf16, #tpu.memory_space<vmem>>, vector<128x128xbf16>
    %c0_14 = arith.constant 0 : index
    %c0_15 = arith.constant 0 : index
    %18 = vector.load %arg7[%c0_14, %c0_15] : memref<1x128xf32, #tpu.memory_space<vmem>>, vector<1x128xf32>
    %cst_16 = arith.constant dense<0.000000e+00> : vector<128x128xf32>
    %19 = tpu.matmul %16, %17, %cst_16 {dimension_numbers = #tpu.dot_dimension_numbers<[1], [0], [0], [1], [0, 0, 1, 1], [], []>} : vector<128x128xbf16>, vector<128x128xbf16>, vector<128x128xf32> -> vector<128x128xf32>
    %20 = vector.broadcast %18 : vector<1x128xf32> to vector<128x128xf32>
    %21 = arith.addf %19, %20 : vector<128x128xf32>
    %22 = tpu.iota {dimensions = array<i32: 1>} : vector<128x128xi32>
    %c4_i32 = arith.constant 4 : i32
    %23 = vector.broadcast %c4_i32 : i32 to vector<128x128xi32>
    %24 = arith.cmpi slt, %22, %23 : vector<128x128xi32>
    %cst_17 = arith.constant -1.000000e+30 : f32
    %25 = vector.broadcast %cst_17 : f32 to vector<128x128xf32>
    %26 = arith.select %24, %21, %25 : vector<128x128xi1>, vector<128x128xf32>
    %cst_18 = arith.constant dense<0xFF800000> : vector<128xf32>
    %27 = vector.multi_reduction <maximumf>, %26, %cst_18 [1] : vector<128x128xf32> to vector<128xf32>
    %28 = vector.shape_cast %27 : vector<128xf32> to vector<128x1xf32>
    %29 = vector.broadcast %28 : vector<128x1xf32> to vector<128x128xf32>
    %30 = arith.subf %26, %29 : vector<128x128xf32>
    %31 = math.exp %30 : vector<128x128xf32>
    %cst_19 = arith.constant dense<0.000000e+00> : vector<128xf32>
    %32 = vector.multi_reduction <add>, %31, %cst_19 [1] : vector<128x128xf32> to vector<128xf32>
    %33 = vector.shape_cast %32 : vector<128xf32> to vector<128x1xf32>
    %34 = vector.broadcast %33 : vector<128x1xf32> to vector<128x128xf32>
    %35 = arith.divf %31, %34 : vector<128x128xf32>
    %36 = arith.truncf %35 : vector<128x128xf32> to vector<128x128xbf16>
    %c0_20 = arith.constant 0 : index
    %c0_21 = arith.constant 0 : index
    %37 = vector.load %arg8[%c0_20, %c0_21] : memref<128x128xbf16, #tpu.memory_space<vmem>>, vector<128x128xbf16>
    tpu.vector_store %arg8[%c0_20, %c0_21], %36 {strides = array<i32>} : memref<128x128xbf16, #tpu.memory_space<vmem>>, vector<128x128xbf16>,
    return
  }
  func.func @transform_0(%arg0: i32) -> (i32, i32) {
    %c0_i32 = arith.constant 0 : i32
    %c0_i32_0 = arith.constant 0 : i32
    return %arg0, %c0_i32 : i32, i32
  }
  func.func @transform_1(%arg0: i32) -> (i32, i32) {
    %c0_i32 = arith.constant 0 : i32
    %c0_i32_0 = arith.constant 0 : i32
    %c0_i32_1 = arith.constant 0 : i32
    return %c0_i32, %c0_i32_0 : i32, i32
  }
  func.func @transform_2(%arg0: i32) -> (i32, i32) {
    %c0_i32 = arith.constant 0 : i32
    %c0_i32_0 = arith.constant 0 : i32
    %c0_i32_1 = arith.constant 0 : i32
    return %c0_i32, %c0_i32_0 : i32, i32
  }
  func.func @transform_3(%arg0: i32) -> (i32, i32) {
    %c0_i32 = arith.constant 0 : i32
    %c0_i32_0 = arith.constant 0 : i32
    %c0_i32_1 = arith.constant 0 : i32
    return %c0_i32, %c0_i32_0 : i32, i32
  }
  func.func @transform_4(%arg0: i32) -> (i32, i32) {
    %c0_i32 = arith.constant 0 : i32
    %c0_i32_0 = arith.constant 0 : i32
    %c0_i32_1 = arith.constant 0 : i32
    return %c0_i32, %c0_i32_0 : i32, i32
  }
  func.func @transform_5(%arg0: i32) -> (i32, i32) {
    %c0_i32 = arith.constant 0 : i32
    %c0_i32_0 = arith.constant 0 : i32
    %c0_i32_1 = arith.constant 0 : i32
    return %c0_i32, %c0_i32_0 : i32, i32
  }
  func.func @transform_6(%arg0: i32) -> (i32, i32) {
    %c0_i32 = arith.constant 0 : i32
    %c0_i32_0 = arith.constant 0 : i32
    %c0_i32_1 = arith.constant 0 : i32
    return %c0_i32, %c0_i32_0 : i32, i32
  }
  func.func @transform_7(%arg0: i32) -> (i32, i32) {
    %c0_i32 = arith.constant 0 : i32
    %c0_i32_0 = arith.constant 0 : i32
    return %arg0, %c0_i32 : i32, i32
  }
}

module attributes {stable_mosaic.version = 11 : i64} {
  func.func @mlp_kernel(%arg0: i32, %arg1: memref<128x128xbf16, #tpu.memory_space<vmem>>, %arg2: memref<128x128xbf16, #tpu.memory_space<vmem>>, %arg3: memref<1x128xf32, #tpu.memory_space<vmem>>, %arg4: memref<128x128xbf16, #tpu.memory_space<vmem>>, %arg5: memref<1x128xf32, #tpu.memory_space<vmem>>, %arg6: memref<128x128xbf16, #tpu.memory_space<vmem>>, %arg7: memref<1x128xf32, #tpu.memory_space<vmem>>, %arg8: memref<128x128xbf16, #tpu.memory_space<vmem>>) attributes {dimension_semantics = [#tpu.dimension_semantics<parallel>], iteration_bounds = array<i64: 2>, scalar_prefetch = 0 : i64, scratch_operands = 0 : i64, tpu.core_type = #tpu.core_type<tc>, window_params = [{transform_indices = @transform_0, window_bounds = array<i64: 128, 128>}, {pipeline_mode = #tpu.pipeline_mode<synchronous>, transform_indices = @transform_1, window_bounds = array<i64: 128, 128>}, {pipeline_mode = #tpu.pipeline_mode<synchronous>, transform_indices = @transform_2, window_bounds = array<i64: 1, 128>}, {pipeline_mode = #tpu.pipeline_mode<synchronous>, transform_indices = @transform_3, window_bounds = array<i64: 128, 128>}, {pipeline_mode = #tpu.pipeline_mode<synchronous>, transform_indices = @transform_4, window_bounds = array<i64: 1, 128>}, {pipeline_mode = #tpu.pipeline_mode<synchronous>, transform_indices = @transform_5, window_bounds = array<i64: 128, 128>}, {pipeline_mode = #tpu.pipeline_mode<synchronous>, transform_indices = @transform_6, window_bounds = array<i64: 1, 128>}, {transform_indices = @transform_7, window_bounds = array<i64: 128, 128>}]} {
    %c0 = arith.constant 0 : index
    %c0_0 = arith.constant 0 : index
    %0 = vector.load %arg1[%c0, %c0_0] : memref<128x128xbf16, #tpu.memory_space<vmem>>, vector<128x128xbf16>
    %c0_1 = arith.constant 0 : index
    %c0_2 = arith.constant 0 : index
    %1 = vector.load %arg2[%c0_1, %c0_2] : memref<128x128xbf16, #tpu.memory_space<vmem>>, vector<128x128xbf16>
    %c0_3 = arith.constant 0 : index
    %c0_4 = arith.constant 0 : index
    %2 = vector.load %arg3[%c0_3, %c0_4] : memref<1x128xf32, #tpu.memory_space<vmem>>, vector<1x128xf32>
    %cst = arith.constant dense<0.000000e+00> : vector<128x128xf32>
    %3 = tpu.matmul %0, %1, %cst {dimension_numbers = #tpu.dot_dimension_numbers<[1], [0], [0], [1], [0, 0, 1, 1], [], []>} : vector<128x128xbf16>, vector<128x128xbf16>, vector<128x128xf32> -> vector<128x128xf32>
    %4 = vector.broadcast %2 : vector<1x128xf32> to vector<128x128xf32>
    %5 = arith.addf %3, %4 : vector<128x128xf32>
    %cst_5 = arith.constant 0.000000e+00 : f32
    %6 = vector.broadcast %cst_5 : f32 to vector<128x128xf32>
    %7 = arith.maximumf %5, %6 : vector<128x128xf32>
    %8 = arith.truncf %7 : vector<128x128xf32> to vector<128x128xbf16>
    %c0_6 = arith.constant 0 : index
    %c0_7 = arith.constant 0 : index
    %9 = vector.load %arg4[%c0_6, %c0_7] : memref<128x128xbf16, #tpu.memory_space<vmem>>, vector<128x128xbf16>
    %c0_8 = arith.constant 0 : index
    %c0_9 = arith.constant 0 : index
    %10 = vector.load %arg5[%c0_8, %c0_9] : memref<1x128xf32, #tpu.memory_space<vmem>>, vector<1x128xf32>
    %cst_10 = arith.constant dense<0.000000e+00> : vector<128x128xf32>
    %11 = tpu.matmul %8, %9, %cst_10 {dimension_numbers = #tpu.dot_dimension_numbers<[1], [0], [0], [1], [0, 0, 1, 1], [], []>} : vector<128x128xbf16>, vector<128x128xbf16>, vector<128x128xf32> -> vector<128x128xf32>
    %12 = vector.broadcast %10 : vector<1x128xf32> to vector<128x128xf32>
    %13 = arith.addf %11, %12 : vector<128x128xf32>
    %cst_11 = arith.constant 0.000000e+00 : f32
    %14 = vector.broadcast %cst_11 : f32 to vector<128x128xf32>
    %15 = arith.maximumf %13, %14 : vector<128x128xf32>
    %16 = arith.truncf %15 : vector<128x128xf32> to vector<128x128xbf16>
    %c0_12 = arith.constant 0 : index
    %c0_13 = arith.constant 0 : index
    %17 = vector.load %arg6[%c0_12, %c0_13] : memref<128x128xbf16, #tpu.memory_space<vmem>>, vector<128x128xbf16>
    %c0_14 = arith.constant 0 : index
    %c0_15 = arith.constant 0 : index
    %18 = vector.load %arg7[%c0_14, %c0_15] : memref<1x128xf32, #tpu.memory_space<vmem>>, vector<1x128xf32>
    %cst_16 = arith.constant dense<0.000000e+00> : vector<128x128xf32>
    %19 = tpu.matmul %16, %17, %cst_16 {dimension_numbers = #tpu.dot_dimension_numbers<[1], [0], [0], [1], [0, 0, 1, 1], [], []>} : vector<128x128xbf16>, vector<128x128xbf16>, vector<128x128xf32> -> vector<128x128xf32>
    %20 = vector.broadcast %18 : vector<1x128xf32> to vector<128x128xf32>
    %21 = arith.addf %19, %20 : vector<128x128xf32>
    %22 = tpu.iota {dimensions = array<i32: 1>} : vector<128x128xi32>
    %c4_i32 = arith.constant 4 : i32
    %23 = vector.broadcast %c4_i32 : i32 to vector<128x128xi32>
    %24 = arith.cmpi slt, %22, %23 : vector<128x128xi32>
    %cst_17 = arith.constant -1.000000e+30 : f32
    %25 = vector.broadcast %cst_17 : f32 to vector<128x128xf32>
    %26 = arith.select %24, %21, %25 : vector<128x128xi1>, vector<128x128xf32>
    %cst_18 = arith.constant dense<0xFF800000> : vector<128xf32>
    %27 = vector.multi_reduction <maximumf>, %26, %cst_18 [1] : vector<128x128xf32> to vector<128xf32>
    %28 = vector.shape_cast %27 : vector<128xf32> to vector<128x1xf32>
    %29 = vector.broadcast %28 : vector<128x1xf32> to vector<128x128xf32>
    %30 = arith.subf %26, %29 : vector<128x128xf32>
    %31 = math.exp %30 : vector<128x128xf32>
    %cst_19 = arith.constant dense<0.000000e+00> : vector<128xf32>
    %32 = vector.multi_reduction <add>, %31, %cst_19 [1] : vector<128x128xf32> to vector<128xf32>
    %33 = vector.shape_cast %32 : vector<128xf32> to vector<128x1xf32>
    %34 = vector.broadcast %33 : vector<128x1xf32> to vector<128x128xf32>
    %35 = arith.divf %31, %34 : vector<128x128xf32>
    %36 = arith.truncf %35 : vector<128x128xf32> to vector<128x128xbf16>
    %c0_20 = arith.constant 0 : index
    %c0_21 = arith.constant 0 : index
    %37 = vector.load %arg8[%c0_20, %c0_21] : memref<128x128xbf16, #tpu.memory_space<vmem>>, vector<128x128xbf16>
    tpu.vector_store %arg8[%c0_20, %c0_21], %36 {strides = array<i32>} : memref<128x128xbf16, #tpu.memory_space<vmem>>, vector<128x128xbf16>,
    return
  }
  func.func @transform_0(%arg0: i32) -> (i32, i32) {
    %c0_i32 = arith.constant 0 : i32
    %c0_i32_0 = arith.constant 0 : i32
    return %arg0, %c0_i32 : i32, i32
  }
  func.func @transform_1(%arg0: i32) -> (i32, i32) {
    %c0_i32 = arith.constant 0 : i32
    %c0_i32_0 = arith.constant 0 : i32
    %c0_i32_1 = arith.constant 0 : i32
    return %c0_i32, %c0_i32_0 : i32, i32
  }
  func.func @transform_2(%arg0: i32) -> (i32, i32) {
    %c0_i32 = arith.constant 0 : i32
    %c0_i32_0 = arith.constant 0 : i32
    %c0_i32_1 = arith.constant 0 : i32
    return %c0_i32, %c0_i32_0 : i32, i32
  }
  func.func @transform_3(%arg0: i32) -> (i32, i32) {
    %c0_i32 = arith.constant 0 : i32
    %c0_i32_0 = arith.constant 0 : i32
    %c0_i32_1 = arith.constant 0 : i32
    return %c0_i32, %c0_i32_0 : i32, i32
  }
  func.func @transform_4(%arg0: i32) -> (i32, i32) {
    %c0_i32 = arith.constant 0 : i32
    %c0_i32_0 = arith.constant 0 : i32
    %c0_i32_1 = arith.constant 0 : i32
    return %c0_i32, %c0_i32_0 : i32, i32
  }
  func.func @transform_5(%arg0: i32) -> (i32, i32) {
    %c0_i32 = arith.constant 0 : i32
    %c0_i32_0 = arith.constant 0 : i32
    %c0_i32_1 = arith.constant 0 : i32
    return %c0_i32, %c0_i32_0 : i32, i32
  }
  func.func @transform_6(%arg0: i32) -> (i32, i32) {
    %c0_i32 = arith.constant 0 : i32
    %c0_i32_0 = arith.constant 0 : i32
    %c0_i32_1 = arith.constant 0 : i32
    return %c0_i32, %c0_i32_0 : i32, i32
  }
  func.func @transform_7(%arg0: i32) -> (i32, i32) {
    %c0_i32 = arith.constant 0 : i32
    %c0_i32_0 = arith.constant 0 : i32
    return %arg0, %c0_i32 : i32, i32
  }
}

</mosaic_0001>

<bundles_post_ra>
// kernel: tpu_custom_call.1
= control target key start
LH: loop header
LB: loop body
LE: loop exit
PB: predicated region body
PF: predicated region fallthrough
CT: control target
= control target key end

     0   :  { %s2416_s0 = inlined_call_operand.hbm [shape: bf16[256,128], index: 0, kind: input, shape index: {}]   ;;  %s2417_s1 = inlined_call_operand.hbm [shape: bf16[128,128], index: 1, kind: input, shape index: {}]   ;;  %s2418_s2 = inlined_call_operand.vmem [shape: f32[1,128], index: 2, kind: input, shape index: {}]   ;;  %s2419_s3 = inlined_call_operand.hbm [shape: bf16[128,128], index: 3, kind: input, shape index: {}]   ;;  %s2420_s4 = inlined_call_operand.vmem [shape: f32[1,128], index: 4, kind: input, shape index: {}]   ;;  %s2421_s5 = inlined_call_operand.hbm [shape: bf16[128,128], index: 5, kind: input, shape index: {}]   ;;  %s2422_s6 = inlined_call_operand.vmem [shape: f32[1,128], index: 6, kind: input, shape index: {}]   ;;  %s2423_s7 = inlined_call_operand.hbm [shape: bf16[256,128], index: 7, kind: output, shape index: {}]  }
   0x1   :  { %2430 = sst [smem:[#allocation15_spill]] %s2417_s1 }
   0x2   :  { %12 = vsyncpa [#allocation3], 0 }
   0x3   :  { %14 = vsyncpa [#allocation3 + $0x1], 0 }
   0x4   :  { %15 = vsyncpa [#allocation6], 0 }
   0x5   :  { %16 = vsyncpa [#allocation9], 0 }
   0x6   :  { %17 = vsyncpa [#allocation4], 0 }
   0x7   :  { %19 = vsyncpa [#allocation4 + $0x1], 0  ;;  %s2021_s24 = smov 0   ;;  %s2023_s25 = smov 0  }
   0x8   :  { %s2025_s26 = smov 0   ;;  %s2027_s27 = smov 0  }
   0x9 LB: > { %s2042_s28 = sadd.s32 4294967295, %s1970_s27   ;;  %s1319_s29 = sadd.s32 4294967294, %s1970_s27   ;;  %s1970_s27 = sphi %s2027_s27, %s2452_s27   ;;  %s1966_s26 = sphi %s2025_s26, %s2451_s26   ;;  %s1962_s25 = sphi %s2023_s25, %s2450_s25   ;;  %s1958_s24 = sphi %s2021_s24, %s2449_s24  }
   0xa   : > { %p45_p0 = scmp.ne.s32.totalorder %s1962_s25, %s1958_s24  ;;  %p2424_p1 = scmp.eq.s32.totalorder %s2042_s28, 0 }
   0xb   : > { %p195_p2 = scmp.eq.s32.totalorder %s2042_s28, 1  ;;  %p201_p3 = scmp.eq.s32.totalorder %s1319_s29, 1 }
   0xc   : > { %p2051_p4 = por %p2424_p1, %p45_p0  ;;  %p1320_p5 = scmp.ge.s32.totalorder %s1970_s27, 1 }
   0xd   : > { %p2056_p6 = por %p201_p3, %p45_p0  ;;  %p208_p7 = scmp.lt.s32.totalorder %s1970_s27, 3 }
   0xe   : > { %s2431_s30 = scalar_select %p2051_p4, 1, 0 }
   0xf   : > { %s2432_s8 = scalar_select %p2056_p6, 1, 0 }
  0x10   : > { %p2061_p8 = pnand %p1320_p5, %p208_p7  ;;  %s1972_s10 = smov [#allocation5]  }
  0x11   : > { %s220_s11 = sshll.u32 %s1972_s10, 4  ;;  %s1973_s13 = smov [#allocation7]   ;;  %s221_s11 = int_to_ptr.vmem [resolvable:$true] %s220_s11 }
  0x12   : > { %s2433_s9 = scalar_select %p2061_p8, 1, 0 }
  0x13   : > { %p1631_p9 = pneg %p2061_p8  ;;  %s236_s14 = sshll.u32 %s1973_s13, 4  ;;  %s237_s14 = int_to_ptr.vmem [resolvable:$true] %s236_s14 }
  0x14   : > { %s1974_s15 = smov [#allocation8]   ;;  %s1803_s17 = scalar_lea.vmem %s221_s11, 1024 }
  0x15   : > { %p2070_p11 = pnand %p1631_p9, %p2424_p1  ;;  %s252_s16 = sshll.u32 %s1974_s15, 4  ;;  %s253_s16 = int_to_ptr.vmem [resolvable:$true] %s252_s16 }
  0x16   : > { %p1804_p13 = scmp.ne.s32.totalorder %s221_s11, %s1803_s17  ;;  %p1811_p5 = scmp.lt.s32.totalorder %s221_s11, %s221_s11 }
  0x17   : > { %p1794_p12 = pneg %p2070_p11  ;;  %p1812_p7 = scmp.lt.s32.totalorder %s1803_s17, %s1803_s17 }
  0x19   : > { %p1806_p0 = pnand %p1804_p13, %p1794_p12  ;;  %p1813_p9 = por %p1812_p7, %p1811_p5 }
  0x1b   : > { %p1807_p3 = pneg %p1806_p0 }
  0x1d   : > { %p1814_p10 = pnand %p1813_p9, %p1807_p3 }
  0x1f   : > { %1817 = shalt.err (!%p1814_p10)
}
  0x20   : > { %s2425_s18 = smov 64   ;;  %s2426_s19 = smov 4  }
  0x21   : > { %s2435_s1 = sld [smem:[#allocation15_spill]]  ;;  %s1829_s22 = scalar_lea.vmem %s237_s14, 1024 }
  0x22   : > { %p1830_p13 = scmp.ne.s32.totalorder %s237_s14, %s1829_s22  ;;  %p1837_p3 = scmp.lt.s32.totalorder %s237_s14, %s237_s14 }
  0x23   : > { %p1838_p10 = scmp.lt.s32.totalorder %s1829_s22, %s1829_s22 }
  0x24   : > { %p1832_p0 = pnand %p1830_p13, %p1794_p12 }
  0x25   : > { %p1839_p7 = por %p1838_p10, %p1837_p3 }
  0x26   : > { %p1833_p5 = pneg %p1832_p0 }
  0x27   : > { %1634 = dma.hbm_to_vmem [thread:$0]  (!%p2070_p11), %s2435_s1, 1024, %s221_s11, [#allocation6], %s2425_s18, %s2425_s18, %s2426_s19  }
  0x28   : > { %p1840_p9 = pnand %p1839_p7, %p1833_p5 }
  0x2a   : > { %1843 = shalt.err (!%p1840_p9)
}
  0x2b   : > { %1637 = dma.hbm_to_vmem [thread:$0]  (!%p2070_p11), %s2419_s3, 1024, %s237_s14, [#allocation6], %s2425_s18, %s2425_s18, %s2426_s19  }
  0x2c   : > { %s1855_s10 = scalar_lea.vmem %s253_s16, 1024  ;;  %p1863_p3 = scmp.lt.s32.totalorder %s253_s16, %s253_s16 }
  0x2d   : > { %p1856_p1 = scmp.ne.s32.totalorder %s253_s16, %s1855_s10  ;;  %p1864_p5 = scmp.lt.s32.totalorder %s1855_s10, %s1855_s10 }
  0x2f   : > { %p1858_p13 = pnand %p1856_p1, %p1794_p12  ;;  %p1865_p10 = por %p1864_p5, %p1863_p3 }
  0x31   : > { %p1859_p0 = pneg %p1858_p13 }
  0x33   : > { %p1866_p7 = pnand %p1865_p10, %p1859_p0 }
  0x35   : > { %1869 = shalt.err (!%p1866_p7)
}
  0x36   : > { %1640 = dma.hbm_to_vmem [thread:$0]  (!%p2070_p11), %s2421_s5, 1024, %s253_s16, [#allocation9], %s2425_s18, %s2425_s18, %s2426_s19  }
  0x37   : > { %s2110_s14 = sadd.s32 1, %s1970_s27   ;;  %s32_s15 = sadd.s32 1, %s1966_s26 }
  0x38   : > { %s29_s12 = ssub.s32 %s1970_s27, %s2110_s14  ;;  %p39_p12 = scmp.ne.s32.totalorder %s1966_s26, %s1962_s25 }
  0x39   : > { %p30_p1 = scmp.eq.s32.totalorder %s29_s12, 0  ;;  %p40_p9 = scmp.eq.s32.totalorder %s1970_s27, 0 }
  0x3a   : > { %p1652_p13 = scmp.lt.s32.totalorder %s1970_s27, 2  ;;  %p2124_p3 = por %p195_p2, %p39_p12 }
  0x3b   : > { %s2120_s17 = scalar_select %p30_p1, %s1966_s26, %s32_s15  }
  0x3c   : > { %p41_p0 = por %p40_p9, %p39_p12  ;;  %s269_s21 = sand.u32 1, %s1966_s26  }
  0x3d   : > { %s2436_s20 = scalar_select %p2124_p3, 1, 0 }
  0x3e   : > { %s1390_s22 = sshll.u32 %s1970_s27, 10  ;;  %s1325_s16 = sshll.u32 %s269_s21, 6 }
  0x3f   : > { %s2133_s10 = scalar_lea.hbm %s2416_s0, %s1390_s22  ;;  %s273_s11 = scalar_lea.vmem [#allocation2], %s1325_s16 }
  0x40   : > { %s280_s13 = sshll.u32 %s273_s11, 4  ;;  %p2135_p11 = pnand %p1652_p13, %p41_p0  ;;  %s2139_s13 = int_to_ptr.vmem [resolvable:$true] %s280_s13 }
  0x41   : > { %s2141_s15 = scalar_lea.sflag [#allocation3], %s269_s21  ;;  %s1870_s18 = scalar_lea.hbm %s2133_s10, 1024 }
  0x42   : > { %p1871_p2 = scmp.ne.s32.totalorder %s2133_s10, %s1870_s18  ;;  %p1872_p5 = pneg %p2135_p11 }
  0x43   : > { %s1875_s16 = scalar_lea.hbm %s2416_s0, 2048  ;;  %p1876_p1 = scmp.lt.s32.totalorder %s2133_s10, %s2416_s0 }
  0x44   : > { %p1873_p10 = pnand %p1872_p5, %p1871_p2  ;;  %p1877_p12 = scmp.lt.s32.totalorder %s1875_s16, %s1870_s18 }
  0x46   : > { %p1874_p7 = pneg %p1873_p10  ;;  %p1878_p9 = por %p1877_p12, %p1876_p1 }
  0x48   : > { %p1879_p13 = pnand %p1878_p9, %p1874_p7 }
  0x4a   : > { %1882 = shalt.err (!%p1879_p13)
}
  0x4b   : > { %s1883_s21 = scalar_lea.vmem %s2139_s13, 1024  ;;  %s1977_s19 = smov [#allocation2]  }
  0x4c   : > { %p1884_p0 = scmp.ne.s32.totalorder %s2139_s13, %s1883_s21  ;;  %s1888_s1 = sshll.u32 %s1977_s19, 4  ;;  %s1889_s1 = int_to_ptr.vmem [resolvable:$false] %s1888_s1 }
  0x4d   : > { %s1890_s22 = scalar_lea.vmem %s1889_s1, 2048  ;;  %p1891_p10 = scmp.lt.s32.totalorder %s2139_s13, %s1889_s1 }
  0x4e   : > { %p1886_p6 = pnand %p1884_p0, %p1872_p5  ;;  %p1892_p3 = scmp.lt.s32.totalorder %s1890_s22, %s1883_s21 }
  0x50   : > { %p1887_p2 = pneg %p1886_p6  ;;  %p1893_p4 = por %p1892_p3, %p1891_p10 }
  0x52   : > { %p1894_p8 = pnand %p1893_p4, %p1887_p2 }
  0x54   : > { %1897 = shalt.err (!%p1894_p8)
}
  0x55   : > { %s2438_s18 = smov 4   ;;  %s2439_s23 = smov 64  }
  0x56   : > { %1644 = dma.hbm_to_vmem [thread:$0]  (!%p2135_p11), %s2133_s10, 1024, %s2139_s13, %s2141_s15, %s2439_s23, %s2439_s23, %s2438_s18  }
  0x57   : > { %p2440_p6 = scmp.ne.s32.totalorder %s2433_s9, 0 }
  0x58   : > { %s2168_s19 = sand.u32 (!%p2440_p6), 1, %s1962_s25   ;;  %p2441_p4 = scmp.ne.s32.totalorder (!%p2440_p6), %s2431_s30, 0 }
  0x59   : > { %292 = sbr.rel (%p2440_p6) target bundleno = 1103 (0x44f), region = 48  ;;  %s1329_s1 = sshll.u32 (!%p2440_p6), %s2168_s19, 6 }
  0x5a   : > { %s295_s16 = scalar_lea.sflag (!%p2440_p6), [#allocation3], %s2168_s19  ;;  %s2174_s12 = scalar_lea.vmem (!%p2440_p6), [#allocation2], %s1329_s1 }
  0x5e   : > { %1941 = dma.done.wait (%p2441_p4), %s295_s16, 1024  }
  0x5f   : > { %1943 = vsyncadd (%p2441_p4), %s295_s16, 4294966272  ;;  %p2442_p8 = scmp.eq.s32.totalorder %s2042_s28, 0 }
  0x61   : > { %1945 = dma.done.wait (%p2442_p8), [#allocation6], 2048   ;;  %p2443_p3 = pmov %p2442_p8 }
  0x63   : > { %1947 = vsyncadd (%p2443_p3), [#allocation6], 4294965248  ;;  %p2444_p11 = pmov %p2443_p3 }
  0x64   : > { %p2445_p5 = pmov %p2443_p3 }
  0x65   : > { %1949 = dma.done.wait (%p2444_p11), [#allocation9], 1024  }
  0x66   : > { %1951 = vsyncadd (%p2445_p5), [#allocation9], 4294966272  ;;  %v1696_v0 = vld [vmem:[#allocation5 + $0x38] sm:$0xff]   ;;  %v1697_v1 = vld [vmem:[#allocation5 + $0x30] sm:$0xff]   ;;  %s2342_s11 = scalar_lea.vmem [#allocation10], %s1329_s1  ;;  %s1407_s21 = sshll.u32 %s2042_s28, 10 }
  0x67   : > { %1503 = vmatprep.subr.bf16.mxu0 %v1696_v0  ;;  %v1698_v2 = vld [vmem:[#allocation5 + $0x28] sm:$0xff]   ;;  %v1699_v3 = vld [vmem:[#allocation5 + $0x20] sm:$0xff]   ;;  %v1700_v5 = vld [vmem:[#allocation5 + $0x18] sm:$0xff]   ;;  %s1217_s22 = sshll.u32 %s2342_s11, 4  ;;  %s2370_s1 = scalar_lea.hbm %s2423_s7, %s1407_s21  ;;  %s2372_s22 = int_to_ptr.vmem [resolvable:$true] %s1217_s22 }
  0x68   : > { %1504 = vmatpush3.bf16.msra.mxu0 %v1696_v0  ;;  %v1704_v4 = vld [vmem:[%s2174_s12] sm:$0xff]   ;;  %v1701_v6 = vld [vmem:[#allocation5 + $0x10] sm:$0xff]   ;;  %v1712_v7 = vld [vmem:[#allocation7 + $0x38] sm:$0xff]   ;;  %s1204_s28 = scalar_lea.sflag [#allocation4], %s2168_s19  ;;  %s1898_s16 = scalar_lea.vmem %s2372_s22, 1024 }
  0x69   : > { %1505 = vmatprep.subr.bf16.mxu0 %v1697_v1  ;;  %1519 = vmatprep.mubr.bf16.mxu0 %v1704_v4  ;;  %v1713_v8 = vld [vmem:[#allocation7 + $0x30] sm:$0xff]   ;;  %v1702_v9 = vld [vmem:[#allocation5 + $0x8] sm:$0xff]   ;;  %v1703_v11 = vld [vmem:[#allocation5] sm:$0xff]   ;;  %p1899_p7 = scmp.ne.s32.totalorder %s2372_s22, %s1898_s16  ;;  %p2446_p1 = scmp.ne.s32.totalorder %s2436_s20, 0 }
  0x6a   : > { %1535 = vmatprep.subr.bf16.mxu1 %v1712_v7  ;;  %v1714_v10 = vld [vmem:[#allocation7 + $0x28] sm:$0xff]   ;;  %v1715_v12 = vld [vmem:[#allocation7 + $0x20] sm:$0xff]   ;;  %v1716_v13 = vld [vmem:[#allocation7 + $0x18] sm:$0xff]  }
  0x6b   : > { %1536 = vmatpush3.bf16.msra.mxu1 %v1712_v7  ;;  %v1705_v14 = vld [vmem:[%s2174_s12 + $0x8] sm:$0xff]   ;;  %v1706_v15 = vld [vmem:[%s2174_s12 + $0x10] sm:$0xff]   ;;  %v1707_v16 = vld [vmem:[%s2174_s12 + $0x18] sm:$0xff]   ;;  %p1900_p12 = pnand %p1899_p7, %p2446_p1 }
  0x6c   : > { %1506 = vmatpush3.bf16.msra.mxu0 %v1697_v1  ;;  %1537 = vmatprep.subr.bf16.mxu1 %v1713_v8  ;;  %v1708_v17 = vld [vmem:[%s2174_s12 + $0x20] sm:$0xff]   ;;  %v1709_v18 = vld [vmem:[%s2174_s12 + $0x28] sm:$0xff]   ;;  %v1710_v19 = vld [vmem:[%s2174_s12 + $0x30] sm:$0xff]  }
  0x6d   : > { %1507 = vmatprep.subr.bf16.mxu0 %v1698_v2  ;;  %v1711_v20 = vld [vmem:[%s2174_s12 + $0x38] sm:$0xff]   ;;  %v1717_v21 = vld [vmem:[#allocation7 + $0x10] sm:$0xff]   ;;  %v1718_v22 = vld [vmem:[#allocation7 + $0x8] sm:$0xff]   ;;  %p1901_p9 = pneg %p1900_p12  ;;  %s1978_s12 = smov [#allocation10]  }
  0x6e   : > { %v1719_v23 = vld [vmem:[#allocation7] sm:$0xff]   ;;  %v1720_v24 = vld [vmem:[#allocation8 + $0x38] sm:$0xff]   ;;  %v1721_v25 = vld [vmem:[#allocation8 + $0x30] sm:$0xff]   ;;  %s1902_s30 = sshll.u32 %s1978_s12, 4  ;;  %s1903_s30 = int_to_ptr.vmem [resolvable:$false] %s1902_s30 }
  0x6f   : > { %1538 = vmatpush3.bf16.msra.mxu1 %v1713_v8  ;;  %v1722_v26 = vld [vmem:[#allocation8 + $0x28] sm:$0xff]   ;;  %v1723_v27 = vld [vmem:[#allocation8 + $0x20] sm:$0xff]   ;;  %v2196_v28 = vld [vmem:[#allocation8 + $0x18] sm:$0xff]   ;;  %s1904_s9 = scalar_lea.vmem %s1903_s30, 2048  ;;  %p1905_p13 = scmp.lt.s32.totalorder %s2372_s22, %s1903_s30 }
  0x70   : > { %1508 = vmatpush3.bf16.msra.mxu0 %v1698_v2  ;;  %1539 = vmatprep.subr.bf16.mxu1 %v1714_v10  ;;  %v1334_v31 = vld [vmem:[%s2418_s2] ss:$0 sm:$0xff]  ;;  %p1906_p0 = scmp.lt.s32.totalorder %s1904_s9, %s1898_s16 }
  0x71   : > { %1509 = vmatprep.subr.bf16.mxu0 %v1699_v3 }
  0x72   : > { %p1907_p2 = por %p1906_p0, %p1905_p13 }
  0x73   : > { %1540 = vmatpush3.bf16.msra.mxu1 %v1714_v10 }
  0x74   : > { %1510 = vmatpush3.bf16.msra.mxu0 %v1699_v3  ;;  %1541 = vmatprep.subr.bf16.mxu1 %v1715_v12  ;;  %p1908_p10 = pnand %p1907_p2, %p1901_p9 }
  0x75   : > { %1511 = vmatprep.subr.bf16.mxu0 %v1700_v5 }
  0x77   : > { %1542 = vmatpush3.bf16.msra.mxu1 %v1715_v12 }
  0x78   : > { %1512 = vmatpush3.bf16.msra.mxu0 %v1700_v5  ;;  %1543 = vmatprep.subr.bf16.mxu1 %v1716_v13 }
  0x79   : > { %1513 = vmatprep.subr.bf16.mxu0 %v1701_v6 }
  0x7b   : > { %1544 = vmatpush3.bf16.msra.mxu1 %v1716_v13 }
  0x7c   : > { %1514 = vmatpush3.bf16.msra.mxu0 %v1701_v6  ;;  %1545 = vmatprep.subr.bf16.mxu1 %v1717_v21 }
  0x7d   : > { %1515 = vmatprep.subr.bf16.mxu0 %v1702_v9 }
  0x7f   : > { %1546 = vmatpush3.bf16.msra.mxu1 %v1717_v21 }
  0x80   : > { %1516 = vmatpush3.bf16.msra.mxu0 %v1702_v9  ;;  %1547 = vmatprep.subr.bf16.mxu1 %v1718_v22 }
  0x81   : > { %1517 = vmatprep.subr.bf16.mxu0 %v1703_v11 }
  0x83   : > { %1548 = vmatpush3.bf16.msra.mxu1 %v1718_v22  ;;  %v1725_v22 = vld [vmem:[#allocation8 + $0x10] sm:$0xff]  }
  0x84   : > { %1518 = vmatpush3.bf16.msra.mxu0 %v1703_v11  ;;  %1549 = vmatprep.subr.bf16.mxu1 %v1719_v23 }
  0x85   : > { %1567 = vmatprep.subr.bf16.mxu0 %v1720_v24 }
  0x87   : > { %1520 = vmatmul.mubr.bf16.vlgmr.msra.gmra.mxu0 %v1705_v14  ;;  %1550 = vmatpush3.bf16.msra.mxu1 %v1719_v23  ;;  %v1726_v23 = vld [vmem:[#allocation8 + $0x8] sm:$0xff]  }
  0x88   : > { %1523 = vmatprep.mubr.bf16.mxu0 %v1706_v15  ;;  %1599 = vmatprep.subr.bf16.mxu1 %v1720_v24 }
  0x89   : > { %1568 = vmatpush3.bf16.msra.mxu0 %v1720_v24 }
  0x8a   : > { %1569 = vmatprep.subr.bf16.mxu0 %v1721_v25 }
  0x8d   : > { %1570 = vmatpush3.bf16.msra.mxu0 %v1721_v25 }
  0x8e   : > { %1571 = vmatprep.subr.bf16.mxu0 %v1722_v26 }
  0x8f   : > { %1524 = vmatmul.mubr.bf16.gmra.mxu0 %v1707_v16 }
  0x90   : > { %1527 = vmatprep.mubr.bf16.mxu0 %v1708_v17 }
  0x91   : > { %1572 = vmatpush3.bf16.msra.mxu0 %v1722_v26 }
  0x92   : > { %1573 = vmatprep.subr.bf16.mxu0 %v1723_v27 }
  0x95   : > { %1574 = vmatpush3.bf16.msra.mxu0 %v1723_v27 }
  0x96   : > { %1575 = vmatprep.subr.bf16.mxu0 %v2196_v28 }
  0x97   : > { %1528 = vmatmul.mubr.bf16.gmra.mxu0 %v1709_v18 }
  0x98   : > { %1531 = vmatprep.mubr.bf16.mxu0 %v1710_v19 }
  0x99   : > { %1576 = vmatpush3.bf16.msra.mxu0 %v2196_v28 }
  0x9a   : > { %1577 = vmatprep.subr.bf16.mxu0 %v1725_v22 }
  0x9d   : > { %1578 = vmatpush3.bf16.msra.mxu0 %v1725_v22 }
  0x9e   : > { %1579 = vmatprep.subr.bf16.mxu0 %v1726_v23 }
  0x9f   : > { %1532 = vmatmul.mubr.bf16.gmra.mxu0 %v1711_v20 }
  0xa1   : > { %1580 = vmatpush3.bf16.msra.mxu0 %v1726_v23 }
 0x147   : > { %v1521_v29 = vpop.f32.mrf.mxu0 }
 0x148   : > { %v522_v35 = vadd.f32 %v1521_v29, %v1334_v31 }
 0x149   : > { %v513_v30 = vpop.f32.mrf.mxu0 }
 0x14a   : > { %v514_v33 = vadd.f32 %v1334_v31, %v513_v30  ;;  %v578_v42 = vmax.f32 %v522_v35, 0.0 }
 0x14b   : > { %v1522_v32 = vpop.f32.mrf.mxu0 }
 0x14c   : > { %v525_v34 = vadd.f32 %v1522_v32, %v1334_v31  ;;  %v576_v40 = vmax.f32 %v514_v33, 0.0 }
 0x14d   : > { %v516_v36 = vpop.f32.mrf.mxu0 }
 0x14e   : > { %v517_v37 = vadd.f32 %v1334_v31, %v516_v36  ;;  %v579_v38 = vmax.f32 %v525_v34, 0.0 }
 0x14f   : > { %v1525_v39 = vpop.f32.mrf.mxu0 }
 0x150   : > { %v577_v41 = vmax.f32 %v517_v37, 0.0  ;;  %v593_v45 = vpack.c.bf16 %v579_v38, %v578_v42  ;;  %v538_v49 = vadd.f32 %v1525_v39, %v1334_v31 }
 0x151   : > { %v529_v43 = vpop.f32.mrf.mxu0 }
 0x152   : > { %v592_v44 = vpack.c.bf16 %v577_v41, %v576_v40  ;;  %v530_v47 = vadd.f32 %v1334_v31, %v529_v43  ;;  %v582_v56 = vmax.f32 %v538_v49, 0.0 }
 0x153   : > { %v1526_v46 = vpop.f32.mrf.mxu0 }
 0x154   : > { %v541_v48 = vadd.f32 %v1526_v46, %v1334_v31  ;;  %1551 = vmatprep.mubr.bf16.mxu1 %v592_v44  ;;  %v580_v54 = vmax.f32 %v530_v47, 0.0 }
 0x155   : > { %v532_v50 = vpop.f32.mrf.mxu0  ;;  %1552 = vmatmul.mubr.bf16.vlgmr.msra.gmra.mxu1 %v593_v45 }
 0x156   : > { %v533_v51 = vadd.f32 %v1334_v31, %v532_v50  ;;  %1607 = vmatpush3.bf16.msra.mxu1 %v1720_v24  ;;  %v583_v52 = vmax.f32 %v541_v48, 0.0  ;;  %v1727_v24 = vld [vmem:[#allocation8] sm:$0xff]  }
 0x157   : > { %v1529_v53 = vpop.f32.mrf.mxu0  ;;  %1600 = vmatprep.subr.bf16.mxu1 %v1721_v25  ;;  %1581 = vmatprep.subr.bf16.mxu0 %v1727_v24 }
 0x158   : > { %v581_v55 = vmax.f32 %v533_v51, 0.0  ;;  %v595_v59 = vpack.c.bf16 %v583_v52, %v582_v56  ;;  %v554_v63 = vadd.f32 %v1529_v53, %v1334_v31  ;;  %1582 = vmatpush3.bf16.msra.mxu0 %v1727_v24 }
 0x159   : > { %v545_v57 = vpop.f32.mrf.mxu0 }
 0x15a   : > { %v594_v58 = vpack.c.bf16 %v581_v55, %v580_v54  ;;  %1608 = vmatpush3.bf16.msra.mxu1 %v1721_v25  ;;  %v546_v61 = vadd.f32 %v1334_v31, %v545_v57  ;;  %v586_v6 = vmax.f32 %v554_v63, 0.0 }
 0x15b   : > { %v1530_v60 = vpop.f32.mrf.mxu0  ;;  %1601 = vmatprep.subr.bf16.mxu1 %v1722_v26 }
 0x15c   : > { %v557_v62 = vadd.f32 %v1530_v60, %v1334_v31  ;;  %1555 = vmatprep.mubr.bf16.mxu1 %v594_v58  ;;  %v584_v4 = vmax.f32 %v546_v61, 0.0 }
 0x15d   : > { %v548_v0 = vpop.f32.mrf.mxu0  ;;  %1556 = vmatmul.mubr.bf16.gmra.mxu1 %v595_v59 }
 0x15e   : > { %v549_v1 = vadd.f32 %v1334_v31, %v548_v0  ;;  %1609 = vmatpush3.bf16.msra.mxu1 %v1722_v26  ;;  %v587_v2 = vmax.f32 %v557_v62, 0.0 }
 0x15f   : > { %v1533_v3 = vpop.f32.mrf.mxu0  ;;  %1602 = vmatprep.subr.bf16.mxu1 %v1723_v27 }
 0x160   : > { %v585_v5 = vmax.f32 %v549_v1, 0.0  ;;  %v597_v9 = vpack.c.bf16 %v587_v2, %v586_v6  ;;  %v570_v13 = vadd.f32 %v1533_v3, %v1334_v31 }
 0x161   : > { %v561_v7 = vpop.f32.mrf.mxu0 }
 0x162   : > { %v596_v8 = vpack.c.bf16 %v585_v5, %v584_v4  ;;  %1610 = vmatpush3.bf16.msra.mxu1 %v1723_v27  ;;  %v562_v11 = vadd.f32 %v1334_v31, %v561_v7  ;;  %v590_v19 = vmax.f32 %v570_v13, 0.0  ;;  %v1351_v27 = vld [vmem:[%s2420_s4] ss:$0 sm:$0xff] }
 0x163   : > { %v1534_v10 = vpop.f32.mrf.mxu0  ;;  %1603 = vmatprep.subr.bf16.mxu1 %v2196_v28 }
 0x164   : > { %v573_v12 = vadd.f32 %v1534_v10, %v1334_v31  ;;  %1559 = vmatprep.mubr.bf16.mxu1 %v596_v8  ;;  %v588_v17 = vmax.f32 %v562_v11, 0.0 }
 0x165   : > { %v564_v14 = vpop.f32.mrf.mxu0  ;;  %1560 = vmatmul.mubr.bf16.gmra.mxu1 %v597_v9 }
 0x166   : > { %v565_v15 = vadd.f32 %v1334_v31, %v564_v14  ;;  %1611 = vmatpush3.bf16.msra.mxu1 %v2196_v28  ;;  %v591_v16 = vmax.f32 %v573_v12, 0.0 }
 0x167   : > { %1604 = vmatprep.subr.bf16.mxu1 %v1725_v22 }
 0x168   : > { %v589_v18 = vmax.f32 %v565_v15, 0.0  ;;  %v599_v21 = vpack.c.bf16 %v591_v16, %v590_v19 }
 0x16a   : > { %v598_v20 = vpack.c.bf16 %v589_v18, %v588_v17  ;;  %1612 = vmatpush3.bf16.msra.mxu1 %v1725_v22  ;;  %v960_v18 = vlaneseq }
 0x16b   : > { %1605 = vmatprep.subr.bf16.mxu1 %v1726_v23 }
 0x16c   : > { %1563 = vmatprep.mubr.bf16.mxu1 %v598_v20  ;;  %v2208_v19 = vand.u32 127, %v960_v18  ;;  %v1360_v20 = vld [vmem:[%s2422_s6] ss:$0 sm:$0xff] }
 0x16d   : > { %1564 = vmatmul.mubr.bf16.gmra.mxu1 %v599_v21 }
 0x16e   : > { %1613 = vmatpush3.bf16.msra.mxu1 %v1726_v23  ;;  %vm962_vm0 = vcmp.lt.s32.totalorder %v2208_v19, 4 }
 0x16f   : > { %1606 = vmatprep.subr.bf16.mxu1 %v1727_v24 }
 0x172   : > { %1614 = vmatpush3.bf16.msra.mxu1 %v1727_v24 }
 0x215   : > { %v1553_v25 = vpop.f32.mrf.mxu1 }
 0x216   : > { %v714_v31 = vadd.f32 %v1553_v25, %v1351_v27 }
 0x217   : > { %v705_v26 = vpop.f32.mrf.mxu1 }
 0x218   : > { %v706_v29 = vadd.f32 %v1351_v27, %v705_v26  ;;  %v770_v38 = vmax.f32 %v714_v31, 0.0 }
 0x219   : > { %v1554_v28 = vpop.f32.mrf.mxu1 }
 0x21a   : > { %v717_v30 = vadd.f32 %v1554_v28, %v1351_v27  ;;  %v768_v36 = vmax.f32 %v706_v29, 0.0 }
 0x21b   : > { %v708_v32 = vpop.f32.mrf.mxu1 }
 0x21c   : > { %v709_v33 = vadd.f32 %v1351_v27, %v708_v32  ;;  %v771_v34 = vmax.f32 %v717_v30, 0.0 }
 0x21d   : > { %v1557_v35 = vpop.f32.mrf.mxu1 }
 0x21e   : > { %v769_v37 = vmax.f32 %v709_v33, 0.0  ;;  %v785_v41 = vpack.c.bf16 %v771_v34, %v770_v38  ;;  %v730_v45 = vadd.f32 %v1557_v35, %v1351_v27 }
 0x21f   : > { %v721_v39 = vpop.f32.mrf.mxu1 }
 0x220   : > { %v784_v40 = vpack.c.bf16 %v769_v37, %v768_v36  ;;  %v722_v43 = vadd.f32 %v1351_v27, %v721_v39  ;;  %v774_v52 = vmax.f32 %v730_v45, 0.0 }
 0x221   : > { %v1558_v42 = vpop.f32.mrf.mxu1 }
 0x222   : > { %v733_v44 = vadd.f32 %v1558_v42, %v1351_v27  ;;  %1583 = vmatprep.mubr.bf16.mxu0 %v784_v40  ;;  %v772_v50 = vmax.f32 %v722_v43, 0.0 }
 0x223   : > { %v724_v46 = vpop.f32.mrf.mxu1  ;;  %1584 = vmatmul.mubr.bf16.vlgmr.msra.gmra.mxu0 %v785_v41 }
 0x224   : > { %v725_v47 = vadd.f32 %v1351_v27, %v724_v46  ;;  %v775_v48 = vmax.f32 %v733_v44, 0.0 }
 0x225   : > { %v1561_v49 = vpop.f32.mrf.mxu1 }
 0x226   : > { %v773_v51 = vmax.f32 %v725_v47, 0.0  ;;  %v787_v55 = vpack.c.bf16 %v775_v48, %v774_v52  ;;  %v746_v59 = vadd.f32 %v1561_v49, %v1351_v27 }
 0x227   : > { %v737_v53 = vpop.f32.mrf.mxu1 }
 0x228   : > { %v786_v54 = vpack.c.bf16 %v773_v51, %v772_v50  ;;  %v738_v57 = vadd.f32 %v1351_v27, %v737_v53  ;;  %v778_v2 = vmax.f32 %v746_v59, 0.0 }
 0x229   : > { %v1562_v56 = vpop.f32.mrf.mxu1 }
 0x22a   : > { %v749_v58 = vadd.f32 %v1562_v56, %v1351_v27  ;;  %1587 = vmatprep.mubr.bf16.mxu0 %v786_v54  ;;  %v776_v0 = vmax.f32 %v738_v57, 0.0 }
 0x22b   : > { %v740_v60 = vpop.f32.mrf.mxu1  ;;  %1588 = vmatmul.mubr.bf16.gmra.mxu0 %v787_v55 }
 0x22c   : > { %v741_v61 = vadd.f32 %v1351_v27, %v740_v60  ;;  %v779_v62 = vmax.f32 %v749_v58, 0.0 }
 0x22d   : > { %v1565_v63 = vpop.f32.mrf.mxu1 }
 0x22e   : > { %v777_v1 = vmax.f32 %v741_v61, 0.0  ;;  %v789_v5 = vpack.c.bf16 %v779_v62, %v778_v2  ;;  %v762_v9 = vadd.f32 %v1565_v63, %v1351_v27 }
 0x22f   : > { %v753_v3 = vpop.f32.mrf.mxu1 }
 0x230   : > { %v788_v4 = vpack.c.bf16 %v777_v1, %v776_v0  ;;  %v754_v7 = vadd.f32 %v1351_v27, %v753_v3  ;;  %v782_v15 = vmax.f32 %v762_v9, 0.0 }
 0x231   : > { %v1566_v6 = vpop.f32.mrf.mxu1 }
 0x232   : > { %v765_v8 = vadd.f32 %v1566_v6, %v1351_v27  ;;  %1591 = vmatprep.mubr.bf16.mxu1 %v788_v4  ;;  %v780_v13 = vmax.f32 %v754_v7, 0.0 }
 0x233   : > { %v756_v10 = vpop.f32.mrf.mxu1  ;;  %1592 = vmatmul.mubr.bf16.vlgmr.msra.gmra.mxu1 %v789_v5 }
 0x234   : > { %v757_v11 = vadd.f32 %v1351_v27, %v756_v10  ;;  %v783_v12 = vmax.f32 %v765_v8, 0.0 }
 0x236   : > { %v781_v14 = vmax.f32 %v757_v11, 0.0  ;;  %v791_v17 = vpack.c.bf16 %v783_v12, %v782_v15 }
 0x238   : > { %v790_v16 = vpack.c.bf16 %v781_v14, %v780_v13 }
 0x23a   : > { %1595 = vmatprep.mubr.bf16.mxu1 %v790_v16 }
 0x23b   : > { %1596 = vmatmul.mubr.bf16.gmra.mxu1 %v791_v17 }
 0x2e3   : > { %v1585_v21 = vpop.f32.mrf.mxu0 }
 0x2e4   : > { %v906_v22 = vadd.f32 %v1585_v21, %v1360_v20 }
 0x2e5   : > { %v897_v23 = vpop.f32.mrf.mxu0 }
 0x2e6   : > { %v898_v24 = vadd.f32 %v1360_v20, %v897_v23  ;;  %v2216_v25 = vsel %vm962_vm0, %v906_v22, -1e+30 }
 0x2e7   : > { %983 = vmax.xlane.f32.xlu1 %v2216_v25  ;;  %v1586_v26 = vpop.f32.mrf.mxu0 }
 0x2e8   : > { %v909_v27 = vadd.f32 %v1586_v26, %v1360_v20  ;;  %v2221_v28 = vsel %vm962_vm0, %v898_v24, -1e+30 }
 0x2e9   : > { %v900_v29 = vpop.f32.mrf.mxu0  ;;  %979 = vmax.xlane.f32.xlu0 %v2221_v28 }
 0x2ea   : > { %v901_v30 = vadd.f32 %v1360_v20, %v900_v29  ;;  %v966_v31 = vsel %vm962_vm0, %v909_v27, -1e+30 }
 0x2eb   : > { %985 = vmax.xlane.f32.xlu1 %v966_v31  ;;  %v1589_v32 = vpop.f32.mrf.mxu0 }
 0x2ec   : > { %v922_v33 = vadd.f32 %v1589_v32, %v1360_v20  ;;  %v964_v34 = vsel %vm962_vm0, %v901_v30, -1e+30 }
 0x2ed   : > { %v913_v35 = vpop.f32.mrf.mxu0  ;;  %981 = vmax.xlane.f32.xlu0 %v964_v34 }
 0x2ee   : > { %v914_v37 = vadd.f32 %v1360_v20, %v913_v35  ;;  %v969_v39 = vsel %vm962_vm0, %v922_v33, -1e+30 }
 0x2ef   : > { %v1590_v36 = vpop.f32.mrf.mxu0 }
 0x2f0   : > { %v925_v38 = vadd.f32 %v1590_v36, %v1360_v20  ;;  %v967_v45 = vsel %vm962_vm0, %v914_v37, -1e+30 }
 0x2f1   : > { %v916_v40 = vpop.f32.mrf.mxu0  ;;  %991 = vmax.xlane.f32.xlu0 %v969_v39 }
 0x2f2   : > { %v917_v41 = vadd.f32 %v1360_v20, %v916_v40  ;;  %v970_v42 = vsel %vm962_vm0, %v925_v38, -1e+30 }
 0x2f3   : > { %v1593_v43 = vpop.f32.mrf.mxu1  ;;  %993 = vmax.xlane.f32.xlu1 %v970_v42 }
 0x2f4   : > { %v938_v44 = vadd.f32 %v1593_v43, %v1360_v20  ;;  %v2236_v47 = vsel %vm962_vm0, %v917_v41, -1e+30 }
 0x2f5   : > { %v929_v46 = vpop.f32.mrf.mxu1  ;;  %987 = vmax.xlane.f32.xlu0 %v967_v45 }
 0x2f6   : > { %v930_v49 = vadd.f32 %v1360_v20, %v929_v46  ;;  %v2241_v51 = vsel %vm962_vm0, %v938_v44, -1e+30 }
 0x2f7   : > { %v1594_v48 = vpop.f32.mrf.mxu1  ;;  %989 = vmax.xlane.f32.xlu1 %v2236_v47 }
 0x2f8   : > { %v941_v50 = vadd.f32 %v1594_v48, %v1360_v20  ;;  %v2251_v56 = vsel %vm962_vm0, %v930_v49, -1e+30 }
 0x2f9   : > { %v932_v52 = vpop.f32.mrf.mxu1  ;;  %999 = vmax.xlane.f32.xlu0 %v2241_v51 }
 0x2fa   : > { %v933_v53 = vadd.f32 %v1360_v20, %v932_v52  ;;  %v2246_v54 = vsel %vm962_vm0, %v941_v50, -1e+30 }
 0x2fb   : > { %v1597_v55 = vpop.f32.mrf.mxu1  ;;  %1001 = vmax.xlane.f32.xlu1 %v2246_v54 }
 0x2fc   : > { %v2256_v59 = vsel %vm962_vm0, %v933_v53, -1e+30  ;;  %v954_v61 = vadd.f32 %v1597_v55, %v1360_v20 }
 0x2fd   : > { %v945_v57 = vpop.f32.mrf.mxu1  ;;  %995 = vmax.xlane.f32.xlu0 %v2251_v56 }
 0x2fe   : > { %v946_v58 = vadd.f32 %v1360_v20, %v945_v57  ;;  %v2270_v3 = vsel %vm962_vm0, %v954_v61, -1e+30 }
 0x2ff   : > { %v1598_v60 = vpop.f32.mrf.mxu1  ;;  %997 = vmax.xlane.f32.xlu1 %v2256_v59 }
 0x300   : > { %v2261_v62 = vsel %vm962_vm0, %v946_v58, -1e+30  ;;  %v957_v1 = vadd.f32 %v1598_v60, %v1360_v20 }
 0x301   : > { %v948_v63 = vpop.f32.mrf.mxu1  ;;  %1003 = vmax.xlane.f32.xlu0 %v2261_v62 }
 0x302   : > { %v949_v0 = vadd.f32 %v1360_v20, %v948_v63  ;;  %v2276_v4 = vsel %vm962_vm0, %v957_v1, -1e+30 }
 0x304   : > { %v2266_v2 = vsel %vm962_vm0, %v949_v0, -1e+30 }
 0x305   : > { %1005 = vmax.xlane.f32.xlu1 %v2266_v2  ;;  %1007 = vmax.xlane.f32.xlu0 %v2270_v3 }
 0x309   : > { %1009 = vmax.xlane.f32.xlu1 %v2276_v4 }
 0x370   : > { %v984_v5 = vpop.xlane.xlu1 %983 }
 0x371   : > { %v1013_v6 = vsub.f32 %v2216_v25, %v984_v5 }
 0x372   : > { %v980_v7 = vpop.xlane.xlu0 %979 }
 0x373   : > { %v1031_v8 = vmul.f32 1.442695, %v1013_v6  ;;  %v1011_v9 = vsub.f32 %v2221_v28, %v980_v7 }
 0x374   : > { %v986_v10 = vpop.xlane.xlu1 %985 }
 0x375   : > { %1728 = vpow2.f32 %v1031_v8  ;;  %v1027_v11 = vmul.f32 1.442695, %v1011_v9  ;;  %v1014_v12 = vsub.f32 %v966_v31, %v986_v10 }
 0x376   : > { %v982_v13 = vpop.xlane.xlu0 %981 }
 0x377   : > { %v1033_v14 = vmul.f32 1.442695, %v1014_v12  ;;  %v1012_v15 = vsub.f32 %v964_v34, %v982_v13  ;;  %1730 = vpow2.f32 %v1027_v11 }
 0x379   : > { %1732 = vpow2.f32 %v1033_v14  ;;  %v1029_v16 = vmul.f32 1.442695, %v1012_v15 }
 0x37a   : > { %v992_v17 = vpop.xlane.xlu0 %991 }
 0x37b   : > { %v1017_v18 = vsub.f32 %v969_v39, %v992_v17  ;;  %1734 = vpow2.f32 %v1029_v16 }
 0x37c   : > { %v994_v19 = vpop.xlane.xlu1 %993 }
 0x37d   : > { %v1039_v20 = vmul.f32 1.442695, %v1017_v18  ;;  %v1018_v21 = vsub.f32 %v970_v42, %v994_v19 }
 0x37e   : > { %v988_v22 = vpop.xlane.xlu0 %987 }
 0x37f   : > { %1736 = vpow2.f32 %v1039_v20  ;;  %v1041_v23 = vmul.f32 1.442695, %v1018_v21  ;;  %v1015_v24 = vsub.f32 %v967_v45, %v988_v22 }
 0x380   : > { %v990_v25 = vpop.xlane.xlu1 %989 }
 0x381   : > { %1738 = vpow2.f32 %v1041_v23  ;;  %v1035_v26 = vmul.f32 1.442695, %v1015_v24  ;;  %v1016_v27 = vsub.f32 %v2236_v47, %v990_v25 }
 0x382   : > { %v2282_v28 = vpop.eup %1728  ;;  %v1000_v29 = vpop.xlane.xlu0 %999 }
 0x383   : > { %1740 = vpow2.f32 %v1035_v26  ;;  %v1037_v30 = vmul.f32 1.442695, %v1016_v27  ;;  %v1021_v31 = vsub.f32 %v2241_v51, %v1000_v29  ;;  %1063 = vadd.xlane.f32.xlu0 %v2282_v28 }
 0x384   : > { %v1002_v32 = vpop.xlane.xlu1 %1001  ;;  %v2286_v33 = vpop.eup %1730 }
 0x385   : > { %1742 = vpow2.f32 %v1037_v30  ;;  %v1047_v34 = vmul.f32 1.442695, %v1021_v31  ;;  %v1022_v35 = vsub.f32 %v2246_v54, %v1002_v32 }
 0x386   : > { %v2289_v36 = vpop.eup %1732  ;;  %v996_v37 = vpop.xlane.xlu0 %995 }
 0x387   : > { %1744 = vpow2.f32 %v1047_v34  ;;  %v1049_v38 = vmul.f32 1.442695, %v1022_v35  ;;  %v1019_v39 = vsub.f32 %v2251_v56, %v996_v37  ;;  %1065 = vadd.xlane.f32.xlu1 %v2289_v36  ;;  %1059 = vadd.xlane.f32.xlu0 %v2286_v33 }
 0x388   : > { %v998_v40 = vpop.xlane.xlu1 %997  ;;  %v2295_v43 = vpop.eup %1734 }
 0x389   : > { %1746 = vpow2.f32 %v1049_v38  ;;  %v1043_v41 = vmul.f32 1.442695, %v1019_v39  ;;  %v1020_v42 = vsub.f32 %v2256_v59, %v998_v40 }
 0x38a   : > { %v1004_v44 = vpop.xlane.xlu0 %1003 }
 0x38b   : > { %1748 = vpow2.f32 %v1043_v41  ;;  %v1045_v45 = vmul.f32 1.442695, %v1020_v42  ;;  %v1023_v46 = vsub.f32 %v2261_v62, %v1004_v44  ;;  %1061 = vadd.xlane.f32.xlu1 %v2295_v43 }
 0x38c   : > { %v2299_v47 = vpop.eup %1736 }
 0x38d   : > { %1750 = vpow2.f32 %v1045_v45  ;;  %v1051_v48 = vmul.f32 1.442695, %v1023_v46  ;;  %1071 = vadd.xlane.f32.xlu0 %v2299_v47 }
 0x38e   : > { %v2302_v49 = vpop.eup %1738  ;;  %v1006_v50 = vpop.xlane.xlu1 %1005 }
 0x38f   : > { %v1008_v51 = vpop.xlane.xlu0 %1007  ;;  %1752 = vpow2.f32 %v1051_v48  ;;  %v1024_v52 = vsub.f32 %v2266_v2, %v1006_v50  ;;  %1073 = vadd.xlane.f32.xlu1 %v2302_v49 }
 0x390   : > { %v1025_v53 = vsub.f32 %v2270_v3, %v1008_v51  ;;  %v2307_v54 = vpop.eup %1740 }
 0x391   : > { %v1053_v55 = vmul.f32 1.442695, %v1024_v52  ;;  %1067 = vadd.xlane.f32.xlu0 %v2307_v54 }
 0x392   : > { %v1055_v56 = vmul.f32 1.442695, %v1025_v53  ;;  %v2310_v57 = vpop.eup %1742  ;;  %v1010_v58 = vpop.xlane.xlu1 %1009 }
 0x393   : > { %1754 = vpow2.f32 %v1053_v55  ;;  %v1026_v59 = vsub.f32 %v2276_v4, %v1010_v58  ;;  %1069 = vadd.xlane.f32.xlu1 %v2310_v57 }
 0x394   : > { %v2314_v60 = vpop.eup %1744  ;;  %1756 = vpow2.f32 %v1055_v56 }
 0x395   : > { %v1057_v61 = vmul.f32 1.442695, %v1026_v59  ;;  %1079 = vadd.xlane.f32.xlu0 %v2314_v60 }
 0x396   : > { %v2317_v62 = vpop.eup %1746 }
 0x397   : > { %1758 = vpow2.f32 %v1057_v61  ;;  %1081 = vadd.xlane.f32.xlu1 %v2317_v62 }
 0x398   : > { %v2320_v63 = vpop.eup %1748 }
 0x399   : > { %1075 = vadd.xlane.f32.xlu0 %v2320_v63 }
 0x39a   : > { %v2323_v0 = vpop.eup %1750 }
 0x39b   : > { %1077 = vadd.xlane.f32.xlu1 %v2323_v0 }
 0x39c   : > { %v2326_v1 = vpop.eup %1752 }
 0x39d   : > { %1083 = vadd.xlane.f32.xlu0 %v2326_v1 }
 0x3a0   : > { %v2329_v2 = vpop.eup %1754 }
 0x3a1   : > { %v2331_v3 = vpop.eup %1756  ;;  %1085 = vadd.xlane.f32.xlu1 %v2329_v2 }
 0x3a2   : > { %1087 = vadd.xlane.f32.xlu0 %v2331_v3 }
 0x3a4   : > { %v2335_v4 = vpop.eup %1758 }
 0x3a5   : > { %1089 = vadd.xlane.f32.xlu1 %v2335_v4 }
 0x40c   : > { %v1064_v5 = vpop.xlane.xlu0 %1063 }
 0x40d   : > { %1760 = vrcp.f32 %v1064_v5 }
 0x410   : > { %v1066_v6 = vpop.xlane.xlu1 %1065  ;;  %v1060_v7 = vpop.xlane.xlu0 %1059 }
 0x411   : > { %1762 = vrcp.f32 %v1066_v6 }
 0x412   : > { %1764 = vrcp.f32 %v1060_v7 }
 0x414   : > { %v1062_v8 = vpop.xlane.xlu1 %1061 }
 0x415   : > { %1766 = vrcp.f32 %v1062_v8 }
 0x416   : > { %v1072_v9 = vpop.xlane.xlu0 %1071 }
 0x417   : > { %1768 = vrcp.f32 %v1072_v9 }
 0x418   : > { %v1074_v10 = vpop.xlane.xlu1 %1073 }
 0x419   : > { %1770 = vrcp.f32 %v1074_v10 }
 0x41a   : > { %v1068_v11 = vpop.xlane.xlu0 %1067  ;;  %v1761_v12 = vpop.eup %1760 }
 0x41b   : > { %1772 = vrcp.f32 %v1068_v11  ;;  %v1096_v16 = vmul.f32 %v1761_v12, %v2282_v28 }
 0x41c   : > { %v1070_v13 = vpop.xlane.xlu1 %1069 }
 0x41d   : > { %1774 = vrcp.f32 %v1070_v13 }
 0x41e   : > { %v1763_v14 = vpop.eup %1762  ;;  %v1080_v15 = vpop.xlane.xlu0 %1079 }
 0x41f   : > { %v1098_v17 = vmul.f32 %v1763_v14, %v2289_v36  ;;  %1776 = vrcp.f32 %v1080_v15  ;;  %v1765_v18 = vpop.eup %1764 }
 0x420   : > { %v1082_v19 = vpop.xlane.xlu1 %1081  ;;  %v1092_v23 = vmul.f32 %v1765_v18, %v2286_v33 }
 0x421   : > { %v1416_v20 = vpack.c.bf16 %v1098_v17, %v1096_v16  ;;  %1778 = vrcp.f32 %v1082_v19 }
 0x422   : > { %v1767_v21 = vpop.eup %1766  ;;  %v1076_v22 = vpop.xlane.xlu0 %1075 }
 0x423   : > { %1448 = vst [vmem:[%s2342_s11 + $0x8] sm:$0xff] %v1416_v20   ;;  %v1094_v24 = vmul.f32 %v1767_v21, %v2295_v43  ;;  %1780 = vrcp.f32 %v1076_v22 }
 0x424   : > { %v1769_v25 = vpop.eup %1768  ;;  %v1078_v26 = vpop.xlane.xlu1 %1077 }
 0x425   : > { %v1411_v27 = vpack.c.bf16 %v1094_v24, %v1092_v23  ;;  %1782 = vrcp.f32 %v1078_v26  ;;  %v1104_v30 = vmul.f32 %v1769_v25, %v2299_v47 }
 0x426   : > { %v1771_v28 = vpop.eup %1770  ;;  %v1084_v29 = vpop.xlane.xlu0 %1083 }
 0x427   : > { %1412 = vst [vmem:[%s2342_s11] sm:$0xff] %v1411_v27   ;;  %v1106_v31 = vmul.f32 %v1771_v28, %v2302_v49  ;;  %1784 = vrcp.f32 %v1084_v29 }
 0x428   : > { %v1773_v32 = vpop.eup %1772 }
 0x429   : > { %v1426_v34 = vpack.c.bf16 %v1106_v31, %v1104_v30  ;;  %v1100_v36 = vmul.f32 %v1773_v32, %v2307_v54 }
 0x42a   : > { %v1775_v33 = vpop.eup %1774  ;;  %v1086_v35 = vpop.xlane.xlu1 %1085 }
 0x42b   : > { %1450 = vst [vmem:[%s2342_s11 + $0x18] sm:$0xff] %v1426_v34   ;;  %v1102_v37 = vmul.f32 %v1775_v33, %v2310_v57  ;;  %1786 = vrcp.f32 %v1086_v35  ;;  %v1088_v38 = vpop.xlane.xlu0 %1087 }
 0x42c   : > { %v1777_v39 = vpop.eup %1776  ;;  %1788 = vrcp.f32 %v1088_v38 }
 0x42d   : > { %v1421_v40 = vpack.c.bf16 %v1102_v37, %v1100_v36  ;;  %v1112_v43 = vmul.f32 %v1777_v39, %v2314_v60 }
 0x42e   : > { %v1779_v41 = vpop.eup %1778  ;;  %v1090_v42 = vpop.xlane.xlu1 %1089 }
 0x42f   : > { %1449 = vst [vmem:[%s2342_s11 + $0x10] sm:$0xff] %v1421_v40   ;;  %v1114_v44 = vmul.f32 %v1779_v41, %v2317_v62  ;;  %1790 = vrcp.f32 %v1090_v42 }
 0x430   : > { %v1781_v45 = vpop.eup %1780 }
 0x431   : > { %v1436_v46 = vpack.c.bf16 %v1114_v44, %v1112_v43  ;;  %v1108_v48 = vmul.f32 %v1781_v45, %v2320_v63 }
 0x432   : > { %v1783_v47 = vpop.eup %1782 }
 0x433   : > { %1452 = vst [vmem:[%s2342_s11 + $0x28] sm:$0xff] %v1436_v46   ;;  %v1110_v49 = vmul.f32 %v1783_v47, %v2323_v0 }
 0x434   : > { %v1785_v51 = vpop.eup %1784 }
 0x435   : > { %v1431_v50 = vpack.c.bf16 %v1110_v49, %v1108_v48  ;;  %v1116_v53 = vmul.f32 %v1785_v51, %v2326_v1 }
 0x437   : > { %1451 = vst [vmem:[%s2342_s11 + $0x20] sm:$0xff] %v1431_v50  }
 0x438   : > { %v1787_v52 = vpop.eup %1786 }
 0x439   : > { %v1118_v54 = vmul.f32 %v1787_v52, %v2329_v2  ;;  %v1789_v55 = vpop.eup %1788 }
 0x43a   : > { %v1120_v58 = vmul.f32 %v1789_v55, %v2331_v3 }
 0x43b   : > { %v1441_v56 = vpack.c.bf16 %v1118_v54, %v1116_v53 }
 0x43c   : > { %v1791_v57 = vpop.eup %1790 }
 0x43d   : > { %1453 = vst [vmem:[%s2342_s11 + $0x30] sm:$0xff] %v1441_v56   ;;  %v1122_v59 = vmul.f32 %v1791_v57, %v2335_v4 }
 0x43f   : > { %v1446_v60 = vpack.c.bf16 %v1122_v59, %v1120_v58 }
 0x441   : > { %1454 = vst [vmem:[%s2342_s11 + $0x38] sm:$0xff] %v1446_v60  }
 0x442   : > { %1911 = shalt.err (!%p1908_p10)
}
 0x443   : > { %s1912_s10 = scalar_lea.hbm %s2370_s1, 1024  ;;  %s1916_s29 = scalar_lea.hbm %s2423_s7, 2048 }
 0x444   : > { %p1913_p6 = scmp.ne.s32.totalorder %s2370_s1, %s1912_s10  ;;  %p1917_p3 = scmp.lt.s32.totalorder %s2370_s1, %s2423_s7 }
 0x445   : > { %p1918_p11 = scmp.lt.s32.totalorder %s1916_s29, %s1912_s10 }
 0x446   : > { %p1914_p4 = pnand %p1913_p6, %p2446_p1 }
 0x447   : > { %p1919_p5 = por %p1918_p11, %p1917_p3 }
 0x448   : > { %p1915_p8 = pneg %p1914_p4 }
 0x44a   : > { %p1920_p7 = pnand %p1919_p5, %p1915_p8 }
 0x44c   : > { %1923 = shalt.err (!%p1920_p7)
}
 0x44d   : > { %s1979_s18 = smov 64   ;;  %s1980_s23 = smov 4  }
 0x44e   : > { %1629 = dma.vmem_to_hbm [thread:$0]  (%p2446_p1), %s2372_s22, 1024, %s2370_s1, %s1204_s28, %s1979_s18, %s1979_s18, %s1980_s23  }
 0x44f PF: > { %s1232_s16 = sand.u32 1, %s1958_s24   ;;  %p2447_p12 = scmp.ne.s32.totalorder %s2432_s8, 0 }
 0x450   : > { %p2448_p9 = scmp.ge.s32.totalorder %s1970_s27, 2  ;;  %s1233_s12 = scalar_lea.sflag [#allocation4], %s1232_s16 }
 0x452   : > { %p1646_p13 = pnand %p2448_p9, %p2447_p12 }
 0x454   : > { %p1647_p0 = pneg %p1646_p13 }
 0x456   : > { %1953 = dma.done.wait (%p1647_p0), %s1233_s12, 1024  }
 0x457   : > { %1955 = vsyncadd (%p1647_p0), %s1233_s12, 4294966272  ;;  %p22_p2 = scmp.ge.s32.totalorder %s2110_s14, 4   ;;  %s2449_s24 = smov %s1962_s25 }
 0x458   : > { %s2450_s25 = smov %s1966_s26  ;;  %s2451_s26 = smov %s2120_s17 }
 0x459   : > { %s2452_s27 = smov %s2110_s14  ;;  %24 = sbr.rel (!%p22_p2) target bundleno = 9 (0x9), region = 105 }
 0x45e   :  { %1238 = vsyncpa [#allocation3], 1 }
 0x45f   :  { %1240 = vsyncpa [#allocation3 + $0x1], 1 }
 0x460   :  { %1241 = vsyncpa [#allocation6], 1 }
 0x461   :  { %1242 = vsyncpa [#allocation9], 1 }
 0x462   :  { %1243 = vsyncpa [#allocation4], 1 }
 0x463   :  { %1245 = vsyncpa [#allocation4 + $0x1], 1 }

// kernel: tpu_custom_call.1
= control target key start
LH: loop header
LB: loop body
LE: loop exit
PB: predicated region body
PF: predicated region fallthrough
CT: control target
= control target key end

     0   :  { %s2416_s0 = inlined_call_operand.hbm [shape: bf16[256,128], index: 0, kind: input, shape index: {}]   ;;  %s2417_s1 = inlined_call_operand.hbm [shape: bf16[128,128], index: 1, kind: input, shape index: {}]   ;;  %s2418_s2 = inlined_call_operand.vmem [shape: f32[1,128], index: 2, kind: input, shape index: {}]   ;;  %s2419_s3 = inlined_call_operand.hbm [shape: bf16[128,128], index: 3, kind: input, shape index: {}]   ;;  %s2420_s4 = inlined_call_operand.vmem [shape: f32[1,128], index: 4, kind: input, shape index: {}]   ;;  %s2421_s5 = inlined_call_operand.hbm [shape: bf16[128,128], index: 5, kind: input, shape index: {}]   ;;  %s2422_s6 = inlined_call_operand.vmem [shape: f32[1,128], index: 6, kind: input, shape index: {}]   ;;  %s2423_s7 = inlined_call_operand.hbm [shape: bf16[256,128], index: 7, kind: output, shape index: {}]  }
   0x1   :  { %2430 = sst [smem:[#allocation15_spill]] %s2417_s1 }
   0x2   :  { %12 = vsyncpa [#allocation3], 0 }
   0x3   :  { %14 = vsyncpa [#allocation3 + $0x1], 0 }
   0x4   :  { %15 = vsyncpa [#allocation6], 0 }
   0x5   :  { %16 = vsyncpa [#allocation9], 0 }
   0x6   :  { %17 = vsyncpa [#allocation4], 0 }
   0x7   :  { %19 = vsyncpa [#allocation4 + $0x1], 0  ;;  %s2021_s24 = smov 0   ;;  %s2023_s25 = smov 0  }
   0x8   :  { %s2025_s26 = smov 0   ;;  %s2027_s27 = smov 0  }
   0x9 LB: > { %s2042_s28 = sadd.s32 4294967295, %s1970_s27   ;;  %s1319_s29 = sadd.s32 4294967294, %s1970_s27   ;;  %s1970_s27 = sphi %s2027_s27, %s2452_s27   ;;  %s1966_s26 = sphi %s2025_s26, %s2451_s26   ;;  %s1962_s25 = sphi %s2023_s25, %s2450_s25   ;;  %s1958_s24 = sphi %s2021_s24, %s2449_s24  }
   0xa   : > { %p45_p0 = scmp.ne.s32.totalorder %s1962_s25, %s1958_s24  ;;  %p2424_p1 = scmp.eq.s32.totalorder %s2042_s28, 0 }
   0xb   : > { %p195_p2 = scmp.eq.s32.totalorder %s2042_s28, 1  ;;  %p201_p3 = scmp.eq.s32.totalorder %s1319_s29, 1 }
   0xc   : > { %p2051_p4 = por %p2424_p1, %p45_p0  ;;  %p1320_p5 = scmp.ge.s32.totalorder %s1970_s27, 1 }
   0xd   : > { %p2056_p6 = por %p201_p3, %p45_p0  ;;  %p208_p7 = scmp.lt.s32.totalorder %s1970_s27, 3 }
   0xe   : > { %s2431_s30 = scalar_select %p2051_p4, 1, 0 }
   0xf   : > { %s2432_s8 = scalar_select %p2056_p6, 1, 0 }
  0x10   : > { %p2061_p8 = pnand %p1320_p5, %p208_p7  ;;  %s1972_s10 = smov [#allocation5]  }
  0x11   : > { %s220_s11 = sshll.u32 %s1972_s10, 4  ;;  %s1973_s13 = smov [#allocation7]   ;;  %s221_s11 = int_to_ptr.vmem [resolvable:$true] %s220_s11 }
  0x12   : > { %s2433_s9 = scalar_select %p2061_p8, 1, 0 }
  0x13   : > { %p1631_p9 = pneg %p2061_p8  ;;  %s236_s14 = sshll.u32 %s1973_s13, 4  ;;  %s237_s14 = int_to_ptr.vmem [resolvable:$true] %s236_s14 }
  0x14   : > { %s1974_s15 = smov [#allocation8]   ;;  %s1803_s17 = scalar_lea.vmem %s221_s11, 1024 }
  0x15   : > { %p2070_p11 = pnand %p1631_p9, %p2424_p1  ;;  %s252_s16 = sshll.u32 %s1974_s15, 4  ;;  %s253_s16 = int_to_ptr.vmem [resolvable:$true] %s252_s16 }
  0x16   : > { %p1804_p13 = scmp.ne.s32.totalorder %s221_s11, %s1803_s17  ;;  %p1811_p5 = scmp.lt.s32.totalorder %s221_s11, %s221_s11 }
  0x17   : > { %p1794_p12 = pneg %p2070_p11  ;;  %p1812_p7 = scmp.lt.s32.totalorder %s1803_s17, %s1803_s17 }
  0x19   : > { %p1806_p0 = pnand %p1804_p13, %p1794_p12  ;;  %p1813_p9 = por %p1812_p7, %p1811_p5 }
  0x1b   : > { %p1807_p3 = pneg %p1806_p0 }
  0x1d   : > { %p1814_p10 = pnand %p1813_p9, %p1807_p3 }
  0x1f   : > { %1817 = shalt.err (!%p1814_p10)
}
  0x20   : > { %s2425_s18 = smov 64   ;;  %s2426_s19 = smov 4  }
  0x21   : > { %s2435_s1 = sld [smem:[#allocation15_spill]]  ;;  %s1829_s22 = scalar_lea.vmem %s237_s14, 1024 }
  0x22   : > { %p1830_p13 = scmp.ne.s32.totalorder %s237_s14, %s1829_s22  ;;  %p1837_p3 = scmp.lt.s32.totalorder %s237_s14, %s237_s14 }
  0x23   : > { %p1838_p10 = scmp.lt.s32.totalorder %s1829_s22, %s1829_s22 }
  0x24   : > { %p1832_p0 = pnand %p1830_p13, %p1794_p12 }
  0x25   : > { %p1839_p7 = por %p1838_p10, %p1837_p3 }
  0x26   : > { %p1833_p5 = pneg %p1832_p0 }
  0x27   : > { %1634 = dma.hbm_to_vmem [thread:$0]  (!%p2070_p11), %s2435_s1, 1024, %s221_s11, [#allocation6], %s2425_s18, %s2425_s18, %s2426_s19  }
  0x28   : > { %p1840_p9 = pnand %p1839_p7, %p1833_p5 }
  0x2a   : > { %1843 = shalt.err (!%p1840_p9)
}
  0x2b   : > { %1637 = dma.hbm_to_vmem [thread:$0]  (!%p2070_p11), %s2419_s3, 1024, %s237_s14, [#allocation6], %s2425_s18, %s2425_s18, %s2426_s19  }
  0x2c   : > { %s1855_s10 = scalar_lea.vmem %s253_s16, 1024  ;;  %p1863_p3 = scmp.lt.s32.totalorder %s253_s16, %s253_s16 }
  0x2d   : > { %p1856_p1 = scmp.ne.s32.totalorder %s253_s16, %s1855_s10  ;;  %p1864_p5 = scmp.lt.s32.totalorder %s1855_s10, %s1855_s10 }
  0x2f   : > { %p1858_p13 = pnand %p1856_p1, %p1794_p12  ;;  %p1865_p10 = por %p1864_p5, %p1863_p3 }
  0x31   : > { %p1859_p0 = pneg %p1858_p13 }
  0x33   : > { %p1866_p7 = pnand %p1865_p10, %p1859_p0 }
  0x35   : > { %1869 = shalt.err (!%p1866_p7)
}
  0x36   : > { %1640 = dma.hbm_to_vmem [thread:$0]  (!%p2070_p11), %s2421_s5, 1024, %s253_s16, [#allocation9], %s2425_s18, %s2425_s18, %s2426_s19  }
  0x37   : > { %s2110_s14 = sadd.s32 1, %s1970_s27   ;;  %s32_s15 = sadd.s32 1, %s1966_s26 }
  0x38   : > { %s29_s12 = ssub.s32 %s1970_s27, %s2110_s14  ;;  %p39_p12 = scmp.ne.s32.totalorder %s1966_s26, %s1962_s25 }
  0x39   : > { %p30_p1 = scmp.eq.s32.totalorder %s29_s12, 0  ;;  %p40_p9 = scmp.eq.s32.totalorder %s1970_s27, 0 }
  0x3a   : > { %p1652_p13 = scmp.lt.s32.totalorder %s1970_s27, 2  ;;  %p2124_p3 = por %p195_p2, %p39_p12 }
  0x3b   : > { %s2120_s17 = scalar_select %p30_p1, %s1966_s26, %s32_s15  }
  0x3c   : > { %p41_p0 = por %p40_p9, %p39_p12  ;;  %s269_s21 = sand.u32 1, %s1966_s26  }
  0x3d   : > { %s2436_s20 = scalar_select %p2124_p3, 1, 0 }
  0x3e   : > { %s1390_s22 = sshll.u32 %s1970_s27, 10  ;;  %s1325_s16 = sshll.u32 %s269_s21, 6 }
  0x3f   : > { %s2133_s10 = scalar_lea.hbm %s2416_s0, %s1390_s22  ;;  %s273_s11 = scalar_lea.vmem [#allocation2], %s1325_s16 }
  0x40   : > { %s280_s13 = sshll.u32 %s273_s11, 4  ;;  %p2135_p11 = pnand %p1652_p13, %p41_p0  ;;  %s2139_s13 = int_to_ptr.vmem [resolvable:$true] %s280_s13 }
  0x41   : > { %s2141_s15 = scalar_lea.sflag [#allocation3], %s269_s21  ;;  %s1870_s18 = scalar_lea.hbm %s2133_s10, 1024 }
  0x42   : > { %p1871_p2 = scmp.ne.s32.totalorder %s2133_s10, %s1870_s18  ;;  %p1872_p5 = pneg %p2135_p11 }
  0x43   : > { %s1875_s16 = scalar_lea.hbm %s2416_s0, 2048  ;;  %p1876_p1 = scmp.lt.s32.totalorder %s2133_s10, %s2416_s0 }
  0x44   : > { %p1873_p10 = pnand %p1872_p5, %p1871_p2  ;;  %p1877_p12 = scmp.lt.s32.totalorder %s1875_s16, %s1870_s18 }
  0x46   : > { %p1874_p7 = pneg %p1873_p10  ;;  %p1878_p9 = por %p1877_p12, %p1876_p1 }
  0x48   : > { %p1879_p13 = pnand %p1878_p9, %p1874_p7 }
  0x4a   : > { %1882 = shalt.err (!%p1879_p13)
}
  0x4b   : > { %s1883_s21 = scalar_lea.vmem %s2139_s13, 1024  ;;  %s1977_s19 = smov [#allocation2]  }
  0x4c   : > { %p1884_p0 = scmp.ne.s32.totalorder %s2139_s13, %s1883_s21  ;;  %s1888_s1 = sshll.u32 %s1977_s19, 4  ;;  %s1889_s1 = int_to_ptr.vmem [resolvable:$false] %s1888_s1 }
  0x4d   : > { %s1890_s22 = scalar_lea.vmem %s1889_s1, 2048  ;;  %p1891_p10 = scmp.lt.s32.totalorder %s2139_s13, %s1889_s1 }
  0x4e   : > { %p1886_p6 = pnand %p1884_p0, %p1872_p5  ;;  %p1892_p3 = scmp.lt.s32.totalorder %s1890_s22, %s1883_s21 }
  0x50   : > { %p1887_p2 = pneg %p1886_p6  ;;  %p1893_p4 = por %p1892_p3, %p1891_p10 }
  0x52   : > { %p1894_p8 = pnand %p1893_p4, %p1887_p2 }
  0x54   : > { %1897 = shalt.err (!%p1894_p8)
}
  0x55   : > { %s2438_s18 = smov 4   ;;  %s2439_s23 = smov 64  }
  0x56   : > { %1644 = dma.hbm_to_vmem [thread:$0]  (!%p2135_p11), %s2133_s10, 1024, %s2139_s13, %s2141_s15, %s2439_s23, %s2439_s23, %s2438_s18  }
  0x57   : > { %p2440_p6 = scmp.ne.s32.totalorder %s2433_s9, 0 }
  0x58   : > { %s2168_s19 = sand.u32 (!%p2440_p6), 1, %s1962_s25   ;;  %p2441_p4 = scmp.ne.s32.totalorder (!%p2440_p6), %s2431_s30, 0 }
  0x59   : > { %292 = sbr.rel (%p2440_p6) target bundleno = 1103 (0x44f), region = 48  ;;  %s1329_s1 = sshll.u32 (!%p2440_p6), %s2168_s19, 6 }
  0x5a   : > { %s295_s16 = scalar_lea.sflag (!%p2440_p6), [#allocation3], %s2168_s19  ;;  %s2174_s12 = scalar_lea.vmem (!%p2440_p6), [#allocation2], %s1329_s1 }
  0x5e   : > { %1941 = dma.done.wait (%p2441_p4), %s295_s16, 1024  }
  0x5f   : > { %1943 = vsyncadd (%p2441_p4), %s295_s16, 4294966272  ;;  %p2442_p8 = scmp.eq.s32.totalorder %s2042_s28, 0 }
  0x61   : > { %1945 = dma.done.wait (%p2442_p8), [#allocation6], 2048   ;;  %p2443_p3 = pmov %p2442_p8 }
  0x63   : > { %1947 = vsyncadd (%p2443_p3), [#allocation6], 4294965248  ;;  %p2444_p11 = pmov %p2443_p3 }
  0x64   : > { %p2445_p5 = pmov %p2443_p3 }
  0x65   : > { %1949 = dma.done.wait (%p2444_p11), [#allocation9], 1024  }
  0x66   : > { %1951 = vsyncadd (%p2445_p5), [#allocation9], 4294966272  ;;  %v1696_v0 = vld [vmem:[#allocation5 + $0x38] sm:$0xff]   ;;  %v1697_v1 = vld [vmem:[#allocation5 + $0x30] sm:$0xff]   ;;  %s2342_s11 = scalar_lea.vmem [#allocation10], %s1329_s1  ;;  %s1407_s21 = sshll.u32 %s2042_s28, 10 }
  0x67   : > { %1503 = vmatprep.subr.bf16.mxu0 %v1696_v0  ;;  %v1698_v2 = vld [vmem:[#allocation5 + $0x28] sm:$0xff]   ;;  %v1699_v3 = vld [vmem:[#allocation5 + $0x20] sm:$0xff]   ;;  %v1700_v5 = vld [vmem:[#allocation5 + $0x18] sm:$0xff]   ;;  %s1217_s22 = sshll.u32 %s2342_s11, 4  ;;  %s2370_s1 = scalar_lea.hbm %s2423_s7, %s1407_s21  ;;  %s2372_s22 = int_to_ptr.vmem [resolvable:$true] %s1217_s22 }
  0x68   : > { %1504 = vmatpush3.bf16.msra.mxu0 %v1696_v0  ;;  %v1704_v4 = vld [vmem:[%s2174_s12] sm:$0xff]   ;;  %v1701_v6 = vld [vmem:[#allocation5 + $0x10] sm:$0xff]   ;;  %v1712_v7 = vld [vmem:[#allocation7 + $0x38] sm:$0xff]   ;;  %s1204_s28 = scalar_lea.sflag [#allocation4], %s2168_s19  ;;  %s1898_s16 = scalar_lea.vmem %s2372_s22, 1024 }
  0x69   : > { %1505 = vmatprep.subr.bf16.mxu0 %v1697_v1  ;;  %1519 = vmatprep.mubr.bf16.mxu0 %v1704_v4  ;;  %v1713_v8 = vld [vmem:[#allocation7 + $0x30] sm:$0xff]   ;;  %v1702_v9 = vld [vmem:[#allocation5 + $0x8] sm:$0xff]   ;;  %v1703_v11 = vld [vmem:[#allocation5] sm:$0xff]   ;;  %p1899_p7 = scmp.ne.s32.totalorder %s2372_s22, %s1898_s16  ;;  %p2446_p1 = scmp.ne.s32.totalorder %s2436_s20, 0 }
  0x6a   : > { %1535 = vmatprep.subr.bf16.mxu1 %v1712_v7  ;;  %v1714_v10 = vld [vmem:[#allocation7 + $0x28] sm:$0xff]   ;;  %v1715_v12 = vld [vmem:[#allocation7 + $0x20] sm:$0xff]   ;;  %v1716_v13 = vld [vmem:[#allocation7 + $0x18] sm:$0xff]  }
  0x6b   : > { %1536 = vmatpush3.bf16.msra.mxu1 %v1712_v7  ;;  %v1705_v14 = vld [vmem:[%s2174_s12 + $0x8] sm:$0xff]   ;;  %v1706_v15 = vld [vmem:[%s2174_s12 + $0x10] sm:$0xff]   ;;  %v1707_v16 = vld [vmem:[%s2174_s12 + $0x18] sm:$0xff]   ;;  %p1900_p12 = pnand %p1899_p7, %p2446_p1 }
  0x6c   : > { %1506 = vmatpush3.bf16.msra.mxu0 %v1697_v1  ;;  %1537 = vmatprep.subr.bf16.mxu1 %v1713_v8  ;;  %v1708_v17 = vld [vmem:[%s2174_s12 + $0x20] sm:$0xff]   ;;  %v1709_v18 = vld [vmem:[%s2174_s12 + $0x28] sm:$0xff]   ;;  %v1710_v19 = vld [vmem:[%s2174_s12 + $0x30] sm:$0xff]  }
  0x6d   : > { %1507 = vmatprep.subr.bf16.mxu0 %v1698_v2  ;;  %v1711_v20 = vld [vmem:[%s2174_s12 + $0x38] sm:$0xff]   ;;  %v1717_v21 = vld [vmem:[#allocation7 + $0x10] sm:$0xff]   ;;  %v1718_v22 = vld [vmem:[#allocation7 + $0x8] sm:$0xff]   ;;  %p1901_p9 = pneg %p1900_p12  ;;  %s1978_s12 = smov [#allocation10]  }
  0x6e   : > { %v1719_v23 = vld [vmem:[#allocation7] sm:$0xff]   ;;  %v1720_v24 = vld [vmem:[#allocation8 + $0x38] sm:$0xff]   ;;  %v1721_v25 = vld [vmem:[#allocation8 + $0x30] sm:$0xff]   ;;  %s1902_s30 = sshll.u32 %s1978_s12, 4  ;;  %s1903_s30 = int_to_ptr.vmem [resolvable:$false] %s1902_s30 }
  0x6f   : > { %1538 = vmatpush3.bf16.msra.mxu1 %v1713_v8  ;;  %v1722_v26 = vld [vmem:[#allocation8 + $0x28] sm:$0xff]   ;;  %v1723_v27 = vld [vmem:[#allocation8 + $0x20] sm:$0xff]   ;;  %v2196_v28 = vld [vmem:[#allocation8 + $0x18] sm:$0xff]   ;;  %s1904_s9 = scalar_lea.vmem %s1903_s30, 2048  ;;  %p1905_p13 = scmp.lt.s32.totalorder %s2372_s22, %s1903_s30 }
  0x70   : > { %1508 = vmatpush3.bf16.msra.mxu0 %v1698_v2  ;;  %1539 = vmatprep.subr.bf16.mxu1 %v1714_v10  ;;  %v1334_v31 = vld [vmem:[%s2418_s2] ss:$0 sm:$0xff]  ;;  %p1906_p0 = scmp.lt.s32.totalorder %s1904_s9, %s1898_s16 }
  0x71   : > { %1509 = vmatprep.subr.bf16.mxu0 %v1699_v3 }
  0x72   : > { %p1907_p2 = por %p1906_p0, %p1905_p13 }
  0x73   : > { %1540 = vmatpush3.bf16.msra.mxu1 %v1714_v10 }
  0x74   : > { %1510 = vmatpush3.bf16.msra.mxu0 %v1699_v3  ;;  %1541 = vmatprep.subr.bf16.mxu1 %v1715_v12  ;;  %p1908_p10 = pnand %p1907_p2, %p1901_p9 }
  0x75   : > { %1511 = vmatprep.subr.bf16.mxu0 %v1700_v5 }
  0x77   : > { %1542 = vmatpush3.bf16.msra.mxu1 %v1715_v12 }
  0x78   : > { %1512 = vmatpush3.bf16.msra.mxu0 %v1700_v5  ;;  %1543 = vmatprep.subr.bf16.mxu1 %v1716_v13 }
  0x79   : > { %1513 = vmatprep.subr.bf16.mxu0 %v1701_v6 }
  0x7b   : > { %1544 = vmatpush3.bf16.msra.mxu1 %v1716_v13 }
  0x7c   : > { %1514 = vmatpush3.bf16.msra.mxu0 %v1701_v6  ;;  %1545 = vmatprep.subr.bf16.mxu1 %v1717_v21 }
  0x7d   : > { %1515 = vmatprep.subr.bf16.mxu0 %v1702_v9 }
  0x7f   : > { %1546 = vmatpush3.bf16.msra.mxu1 %v1717_v21 }
  0x80   : > { %1516 = vmatpush3.bf16.msra.mxu0 %v1702_v9  ;;  %1547 = vmatprep.subr.bf16.mxu1 %v1718_v22 }
  0x81   : > { %1517 = vmatprep.subr.bf16.mxu0 %v1703_v11 }
  0x83   : > { %1548 = vmatpush3.bf16.msra.mxu1 %v1718_v22  ;;  %v1725_v22 = vld [vmem:[#allocation8 + $0x10] sm:$0xff]  }
  0x84   : > { %1518 = vmatpush3.bf16.msra.mxu0 %v1703_v11  ;;  %1549 = vmatprep.subr.bf16.mxu1 %v1719_v23 }
  0x85   : > { %1567 = vmatprep.subr.bf16.mxu0 %v1720_v24 }
  0x87   : > { %1520 = vmatmul.mubr.bf16.vlgmr.msra.gmra.mxu0 %v1705_v14  ;;  %1550 = vmatpush3.bf16.msra.mxu1 %v1719_v23  ;;  %v1726_v23 = vld [vmem:[#allocation8 + $0x8] sm:$0xff]  }
  0x88   : > { %1523 = vmatprep.mubr.bf16.mxu0 %v1706_v15  ;;  %1599 = vmatprep.subr.bf16.mxu1 %v1720_v24 }
  0x89   : > { %1568 = vmatpush3.bf16.msra.mxu0 %v1720_v24 }
  0x8a   : > { %1569 = vmatprep.subr.bf16.mxu0 %v1721_v25 }
  0x8d   : > { %1570 = vmatpush3.bf16.msra.mxu0 %v1721_v25 }
  0x8e   : > { %1571 = vmatprep.subr.bf16.mxu0 %v1722_v26 }
  0x8f   : > { %1524 = vmatmul.mubr.bf16.gmra.mxu0 %v1707_v16 }
  0x90   : > { %1527 = vmatprep.mubr.bf16.mxu0 %v1708_v17 }
  0x91   : > { %1572 = vmatpush3.bf16.msra.mxu0 %v1722_v26 }
  0x92   : > { %1573 = vmatprep.subr.bf16.mxu0 %v1723_v27 }
  0x95   : > { %1574 = vmatpush3.bf16.msra.mxu0 %v1723_v27 }
  0x96   : > { %1575 = vmatprep.subr.bf16.mxu0 %v2196_v28 }
  0x97   : > { %1528 = vmatmul.mubr.bf16.gmra.mxu0 %v1709_v18 }
  0x98   : > { %1531 = vmatprep.mubr.bf16.mxu0 %v1710_v19 }
  0x99   : > { %1576 = vmatpush3.bf16.msra.mxu0 %v2196_v28 }
  0x9a   : > { %1577 = vmatprep.subr.bf16.mxu0 %v1725_v22 }
  0x9d   : > { %1578 = vmatpush3.bf16.msra.mxu0 %v1725_v22 }
  0x9e   : > { %1579 = vmatprep.subr.bf16.mxu0 %v1726_v23 }
  0x9f   : > { %1532 = vmatmul.mubr.bf16.gmra.mxu0 %v1711_v20 }
  0xa1   : > { %1580 = vmatpush3.bf16.msra.mxu0 %v1726_v23 }
 0x147   : > { %v1521_v29 = vpop.f32.mrf.mxu0 }
 0x148   : > { %v522_v35 = vadd.f32 %v1521_v29, %v1334_v31 }
 0x149   : > { %v513_v30 = vpop.f32.mrf.mxu0 }
 0x14a   : > { %v514_v33 = vadd.f32 %v1334_v31, %v513_v30  ;;  %v578_v42 = vmax.f32 %v522_v35, 0.0 }
 0x14b   : > { %v1522_v32 = vpop.f32.mrf.mxu0 }
 0x14c   : > { %v525_v34 = vadd.f32 %v1522_v32, %v1334_v31  ;;  %v576_v40 = vmax.f32 %v514_v33, 0.0 }
 0x14d   : > { %v516_v36 = vpop.f32.mrf.mxu0 }
 0x14e   : > { %v517_v37 = vadd.f32 %v1334_v31, %v516_v36  ;;  %v579_v38 = vmax.f32 %v525_v34, 0.0 }
 0x14f   : > { %v1525_v39 = vpop.f32.mrf.mxu0 }
 0x150   : > { %v577_v41 = vmax.f32 %v517_v37, 0.0  ;;  %v593_v45 = vpack.c.bf16 %v579_v38, %v578_v42  ;;  %v538_v49 = vadd.f32 %v1525_v39, %v1334_v31 }
 0x151   : > { %v529_v43 = vpop.f32.mrf.mxu0 }
 0x152   : > { %v592_v44 = vpack.c.bf16 %v577_v41, %v576_v40  ;;  %v530_v47 = vadd.f32 %v1334_v31, %v529_v43  ;;  %v582_v56 = vmax.f32 %v538_v49, 0.0 }
 0x153   : > { %v1526_v46 = vpop.f32.mrf.mxu0 }
 0x154   : > { %v541_v48 = vadd.f32 %v1526_v46, %v1334_v31  ;;  %1551 = vmatprep.mubr.bf16.mxu1 %v592_v44  ;;  %v580_v54 = vmax.f32 %v530_v47, 0.0 }
 0x155   : > { %v532_v50 = vpop.f32.mrf.mxu0  ;;  %1552 = vmatmul.mubr.bf16.vlgmr.msra.gmra.mxu1 %v593_v45 }
 0x156   : > { %v533_v51 = vadd.f32 %v1334_v31, %v532_v50  ;;  %1607 = vmatpush3.bf16.msra.mxu1 %v1720_v24  ;;  %v583_v52 = vmax.f32 %v541_v48, 0.0  ;;  %v1727_v24 = vld [vmem:[#allocation8] sm:$0xff]  }
 0x157   : > { %v1529_v53 = vpop.f32.mrf.mxu0  ;;  %1600 = vmatprep.subr.bf16.mxu1 %v1721_v25  ;;  %1581 = vmatprep.subr.bf16.mxu0 %v1727_v24 }
 0x158   : > { %v581_v55 = vmax.f32 %v533_v51, 0.0  ;;  %v595_v59 = vpack.c.bf16 %v583_v52, %v582_v56  ;;  %v554_v63 = vadd.f32 %v1529_v53, %v1334_v31  ;;  %1582 = vmatpush3.bf16.msra.mxu0 %v1727_v24 }
 0x159   : > { %v545_v57 = vpop.f32.mrf.mxu0 }
 0x15a   : > { %v594_v58 = vpack.c.bf16 %v581_v55, %v580_v54  ;;  %1608 = vmatpush3.bf16.msra.mxu1 %v1721_v25  ;;  %v546_v61 = vadd.f32 %v1334_v31, %v545_v57  ;;  %v586_v6 = vmax.f32 %v554_v63, 0.0 }
 0x15b   : > { %v1530_v60 = vpop.f32.mrf.mxu0  ;;  %1601 = vmatprep.subr.bf16.mxu1 %v1722_v26 }
 0x15c   : > { %v557_v62 = vadd.f32 %v1530_v60, %v1334_v31  ;;  %1555 = vmatprep.mubr.bf16.mxu1 %v594_v58  ;;  %v584_v4 = vmax.f32 %v546_v61, 0.0 }
 0x15d   : > { %v548_v0 = vpop.f32.mrf.mxu0  ;;  %1556 = vmatmul.mubr.bf16.gmra.mxu1 %v595_v59 }
 0x15e   : > { %v549_v1 = vadd.f32 %v1334_v31, %v548_v0  ;;  %1609 = vmatpush3.bf16.msra.mxu1 %v1722_v26  ;;  %v587_v2 = vmax.f32 %v557_v62, 0.0 }
 0x15f   : > { %v1533_v3 = vpop.f32.mrf.mxu0  ;;  %1602 = vmatprep.subr.bf16.mxu1 %v1723_v27 }
 0x160   : > { %v585_v5 = vmax.f32 %v549_v1, 0.0  ;;  %v597_v9 = vpack.c.bf16 %v587_v2, %v586_v6  ;;  %v570_v13 = vadd.f32 %v1533_v3, %v1334_v31 }
 0x161   : > { %v561_v7 = vpop.f32.mrf.mxu0 }
 0x162   : > { %v596_v8 = vpack.c.bf16 %v585_v5, %v584_v4  ;;  %1610 = vmatpush3.bf16.msra.mxu1 %v1723_v27  ;;  %v562_v11 = vadd.f32 %v1334_v31, %v561_v7  ;;  %v590_v19 = vmax.f32 %v570_v13, 0.0  ;;  %v1351_v27 = vld [vmem:[%s2420_s4] ss:$0 sm:$0xff] }
 0x163   : > { %v1534_v10 = vpop.f32.mrf.mxu0  ;;  %1603 = vmatprep.subr.bf16.mxu1 %v2196_v28 }
 0x164   : > { %v573_v12 = vadd.f32 %v1534_v10, %v1334_v31  ;;  %1559 = vmatprep.mubr.bf16.mxu1 %v596_v8  ;;  %v588_v17 = vmax.f32 %v562_v11, 0.0 }
 0x165   : > { %v564_v14 = vpop.f32.mrf.mxu0  ;;  %1560 = vmatmul.mubr.bf16.gmra.mxu1 %v597_v9 }
 0x166   : > { %v565_v15 = vadd.f32 %v1334_v31, %v564_v14  ;;  %1611 = vmatpush3.bf16.msra.mxu1 %v2196_v28  ;;  %v591_v16 = vmax.f32 %v573_v12, 0.0 }
 0x167   : > { %1604 = vmatprep.subr.bf16.mxu1 %v1725_v22 }
 0x168   : > { %v589_v18 = vmax.f32 %v565_v15, 0.0  ;;  %v599_v21 = vpack.c.bf16 %v591_v16, %v590_v19 }
 0x16a   : > { %v598_v20 = vpack.c.bf16 %v589_v18, %v588_v17  ;;  %1612 = vmatpush3.bf16.msra.mxu1 %v1725_v22  ;;  %v960_v18 = vlaneseq }
 0x16b   : > { %1605 = vmatprep.subr.bf16.mxu1 %v1726_v23 }
 0x16c   : > { %1563 = vmatprep.mubr.bf16.mxu1 %v598_v20  ;;  %v2208_v19 = vand.u32 127, %v960_v18  ;;  %v1360_v20 = vld [vmem:[%s2422_s6] ss:$0 sm:$0xff] }
 0x16d   : > { %1564 = vmatmul.mubr.bf16.gmra.mxu1 %v599_v21 }
 0x16e   : > { %1613 = vmatpush3.bf16.msra.mxu1 %v1726_v23  ;;  %vm962_vm0 = vcmp.lt.s32.totalorder %v2208_v19, 4 }
 0x16f   : > { %1606 = vmatprep.subr.bf16.mxu1 %v1727_v24 }
 0x172   : > { %1614 = vmatpush3.bf16.msra.mxu1 %v1727_v24 }
 0x215   : > { %v1553_v25 = vpop.f32.mrf.mxu1 }
 0x216   : > { %v714_v31 = vadd.f32 %v1553_v25, %v1351_v27 }
 0x217   : > { %v705_v26 = vpop.f32.mrf.mxu1 }
 0x218   : > { %v706_v29 = vadd.f32 %v1351_v27, %v705_v26  ;;  %v770_v38 = vmax.f32 %v714_v31, 0.0 }
 0x219   : > { %v1554_v28 = vpop.f32.mrf.mxu1 }
 0x21a   : > { %v717_v30 = vadd.f32 %v1554_v28, %v1351_v27  ;;  %v768_v36 = vmax.f32 %v706_v29, 0.0 }
 0x21b   : > { %v708_v32 = vpop.f32.mrf.mxu1 }
 0x21c   : > { %v709_v33 = vadd.f32 %v1351_v27, %v708_v32  ;;  %v771_v34 = vmax.f32 %v717_v30, 0.0 }
 0x21d   : > { %v1557_v35 = vpop.f32.mrf.mxu1 }
 0x21e   : > { %v769_v37 = vmax.f32 %v709_v33, 0.0  ;;  %v785_v41 = vpack.c.bf16 %v771_v34, %v770_v38  ;;  %v730_v45 = vadd.f32 %v1557_v35, %v1351_v27 }
 0x21f   : > { %v721_v39 = vpop.f32.mrf.mxu1 }
 0x220   : > { %v784_v40 = vpack.c.bf16 %v769_v37, %v768_v36  ;;  %v722_v43 = vadd.f32 %v1351_v27, %v721_v39  ;;  %v774_v52 = vmax.f32 %v730_v45, 0.0 }
 0x221   : > { %v1558_v42 = vpop.f32.mrf.mxu1 }
 0x222   : > { %v733_v44 = vadd.f32 %v1558_v42, %v1351_v27  ;;  %1583 = vmatprep.mubr.bf16.mxu0 %v784_v40  ;;  %v772_v50 = vmax.f32 %v722_v43, 0.0 }
 0x223   : > { %v724_v46 = vpop.f32.mrf.mxu1  ;;  %1584 = vmatmul.mubr.bf16.vlgmr.msra.gmra.mxu0 %v785_v41 }
 0x224   : > { %v725_v47 = vadd.f32 %v1351_v27, %v724_v46  ;;  %v775_v48 = vmax.f32 %v733_v44, 0.0 }
 0x225   : > { %v1561_v49 = vpop.f32.mrf.mxu1 }
 0x226   : > { %v773_v51 = vmax.f32 %v725_v47, 0.0  ;;  %v787_v55 = vpack.c.bf16 %v775_v48, %v774_v52  ;;  %v746_v59 = vadd.f32 %v1561_v49, %v1351_v27 }
 0x227   : > { %v737_v53 = vpop.f32.mrf.mxu1 }
 0x228   : > { %v786_v54 = vpack.c.bf16 %v773_v51, %v772_v50  ;;  %v738_v57 = vadd.f32 %v1351_v27, %v737_v53  ;;  %v778_v2 = vmax.f32 %v746_v59, 0.0 }
 0x229   : > { %v1562_v56 = vpop.f32.mrf.mxu1 }
 0x22a   : > { %v749_v58 = vadd.f32 %v1562_v56, %v1351_v27  ;;  %1587 = vmatprep.mubr.bf16.mxu0 %v786_v54  ;;  %v776_v0 = vmax.f32 %v738_v57, 0.0 }
 0x22b   : > { %v740_v60 = vpop.f32.mrf.mxu1  ;;  %1588 = vmatmul.mubr.bf16.gmra.mxu0 %v787_v55 }
 0x22c   : > { %v741_v61 = vadd.f32 %v1351_v27, %v740_v60  ;;  %v779_v62 = vmax.f32 %v749_v58, 0.0 }
 0x22d   : > { %v1565_v63 = vpop.f32.mrf.mxu1 }
 0x22e   : > { %v777_v1 = vmax.f32 %v741_v61, 0.0  ;;  %v789_v5 = vpack.c.bf16 %v779_v62, %v778_v2  ;;  %v762_v9 = vadd.f32 %v1565_v63, %v1351_v27 }
 0x22f   : > { %v753_v3 = vpop.f32.mrf.mxu1 }
 0x230   : > { %v788_v4 = vpack.c.bf16 %v777_v1, %v776_v0  ;;  %v754_v7 = vadd.f32 %v1351_v27, %v753_v3  ;;  %v782_v15 = vmax.f32 %v762_v9, 0.0 }
 0x231   : > { %v1566_v6 = vpop.f32.mrf.mxu1 }
 0x232   : > { %v765_v8 = vadd.f32 %v1566_v6, %v1351_v27  ;;  %1591 = vmatprep.mubr.bf16.mxu1 %v788_v4  ;;  %v780_v13 = vmax.f32 %v754_v7, 0.0 }
 0x233   : > { %v756_v10 = vpop.f32.mrf.mxu1  ;;  %1592 = vmatmul.mubr.bf16.vlgmr.msra.gmra.mxu1 %v789_v5 }
 0x234   : > { %v757_v11 = vadd.f32 %v1351_v27, %v756_v10  ;;  %v783_v12 = vmax.f32 %v765_v8, 0.0 }
 0x236   : > { %v781_v14 = vmax.f32 %v757_v11, 0.0  ;;  %v791_v17 = vpack.c.bf16 %v783_v12, %v782_v15 }
 0x238   : > { %v790_v16 = vpack.c.bf16 %v781_v14, %v780_v13 }
 0x23a   : > { %1595 = vmatprep.mubr.bf16.mxu1 %v790_v16 }
 0x23b   : > { %1596 = vmatmul.mubr.bf16.gmra.mxu1 %v791_v17 }
 0x2e3   : > { %v1585_v21 = vpop.f32.mrf.mxu0 }
 0x2e4   : > { %v906_v22 = vadd.f32 %v1585_v21, %v1360_v20 }
 0x2e5   : > { %v897_v23 = vpop.f32.mrf.mxu0 }
 0x2e6   : > { %v898_v24 = vadd.f32 %v1360_v20, %v897_v23  ;;  %v2216_v25 = vsel %vm962_vm0, %v906_v22, -1e+30 }
 0x2e7   : > { %983 = vmax.xlane.f32.xlu1 %v2216_v25  ;;  %v1586_v26 = vpop.f32.mrf.mxu0 }
 0x2e8   : > { %v909_v27 = vadd.f32 %v1586_v26, %v1360_v20  ;;  %v2221_v28 = vsel %vm962_vm0, %v898_v24, -1e+30 }
 0x2e9   : > { %v900_v29 = vpop.f32.mrf.mxu0  ;;  %979 = vmax.xlane.f32.xlu0 %v2221_v28 }
 0x2ea   : > { %v901_v30 = vadd.f32 %v1360_v20, %v900_v29  ;;  %v966_v31 = vsel %vm962_vm0, %v909_v27, -1e+30 }
 0x2eb   : > { %985 = vmax.xlane.f32.xlu1 %v966_v31  ;;  %v1589_v32 = vpop.f32.mrf.mxu0 }
 0x2ec   : > { %v922_v33 = vadd.f32 %v1589_v32, %v1360_v20  ;;  %v964_v34 = vsel %vm962_vm0, %v901_v30, -1e+30 }
 0x2ed   : > { %v913_v35 = vpop.f32.mrf.mxu0  ;;  %981 = vmax.xlane.f32.xlu0 %v964_v34 }
 0x2ee   : > { %v914_v37 = vadd.f32 %v1360_v20, %v913_v35  ;;  %v969_v39 = vsel %vm962_vm0, %v922_v33, -1e+30 }
 0x2ef   : > { %v1590_v36 = vpop.f32.mrf.mxu0 }
 0x2f0   : > { %v925_v38 = vadd.f32 %v1590_v36, %v1360_v20  ;;  %v967_v45 = vsel %vm962_vm0, %v914_v37, -1e+30 }
 0x2f1   : > { %v916_v40 = vpop.f32.mrf.mxu0  ;;  %991 = vmax.xlane.f32.xlu0 %v969_v39 }
 0x2f2   : > { %v917_v41 = vadd.f32 %v1360_v20, %v916_v40  ;;  %v970_v42 = vsel %vm962_vm0, %v925_v38, -1e+30 }
 0x2f3   : > { %v1593_v43 = vpop.f32.mrf.mxu1  ;;  %993 = vmax.xlane.f32.xlu1 %v970_v42 }
 0x2f4   : > { %v938_v44 = vadd.f32 %v1593_v43, %v1360_v20  ;;  %v2236_v47 = vsel %vm962_vm0, %v917_v41, -1e+30 }
 0x2f5   : > { %v929_v46 = vpop.f32.mrf.mxu1  ;;  %987 = vmax.xlane.f32.xlu0 %v967_v45 }
 0x2f6   : > { %v930_v49 = vadd.f32 %v1360_v20, %v929_v46  ;;  %v2241_v51 = vsel %vm962_vm0, %v938_v44, -1e+30 }
 0x2f7   : > { %v1594_v48 = vpop.f32.mrf.mxu1  ;;  %989 = vmax.xlane.f32.xlu1 %v2236_v47 }
 0x2f8   : > { %v941_v50 = vadd.f32 %v1594_v48, %v1360_v20  ;;  %v2251_v56 = vsel %vm962_vm0, %v930_v49, -1e+30 }
 0x2f9   : > { %v932_v52 = vpop.f32.mrf.mxu1  ;;  %999 = vmax.xlane.f32.xlu0 %v2241_v51 }
 0x2fa   : > { %v933_v53 = vadd.f32 %v1360_v20, %v932_v52  ;;  %v2246_v54 = vsel %vm962_vm0, %v941_v50, -1e+30 }
 0x2fb   : > { %v1597_v55 = vpop.f32.mrf.mxu1  ;;  %1001 = vmax.xlane.f32.xlu1 %v2246_v54 }
 0x2fc   : > { %v2256_v59 = vsel %vm962_vm0, %v933_v53, -1e+30  ;;  %v954_v61 = vadd.f32 %v1597_v55, %v1360_v20 }
 0x2fd   : > { %v945_v57 = vpop.f32.mrf.mxu1  ;;  %995 = vmax.xlane.f32.xlu0 %v2251_v56 }
 0x2fe   : > { %v946_v58 = vadd.f32 %v1360_v20, %v945_v57  ;;  %v2270_v3 = vsel %vm962_vm0, %v954_v61, -1e+30 }
 0x2ff   : > { %v1598_v60 = vpop.f32.mrf.mxu1  ;;  %997 = vmax.xlane.f32.xlu1 %v2256_v59 }
 0x300   : > { %v2261_v62 = vsel %vm962_vm0, %v946_v58, -1e+30  ;;  %v957_v1 = vadd.f32 %v1598_v60, %v1360_v20 }
 0x301   : > { %v948_v63 = vpop.f32.mrf.mxu1  ;;  %1003 = vmax.xlane.f32.xlu0 %v2261_v62 }
 0x302   : > { %v949_v0 = vadd.f32 %v1360_v20, %v948_v63  ;;  %v2276_v4 = vsel %vm962_vm0, %v957_v1, -1e+30 }
 0x304   : > { %v2266_v2 = vsel %vm962_vm0, %v949_v0, -1e+30 }
 0x305   : > { %1005 = vmax.xlane.f32.xlu1 %v2266_v2  ;;  %1007 = vmax.xlane.f32.xlu0 %v2270_v3 }
 0x309   : > { %1009 = vmax.xlane.f32.xlu1 %v2276_v4 }
 0x370   : > { %v984_v5 = vpop.xlane.xlu1 %983 }
 0x371   : > { %v1013_v6 = vsub.f32 %v2216_v25, %v984_v5 }
 0x372   : > { %v980_v7 = vpop.xlane.xlu0 %979 }
 0x373   : > { %v1031_v8 = vmul.f32 1.442695, %v1013_v6  ;;  %v1011_v9 = vsub.f32 %v2221_v28, %v980_v7 }
 0x374   : > { %v986_v10 = vpop.xlane.xlu1 %985 }
 0x375   : > { %1728 = vpow2.f32 %v1031_v8  ;;  %v1027_v11 = vmul.f32 1.442695, %v1011_v9  ;;  %v1014_v12 = vsub.f32 %v966_v31, %v986_v10 }
 0x376   : > { %v982_v13 = vpop.xlane.xlu0 %981 }
 0x377   : > { %v1033_v14 = vmul.f32 1.442695, %v1014_v12  ;;  %v1012_v15 = vsub.f32 %v964_v34, %v982_v13  ;;  %1730 = vpow2.f32 %v1027_v11 }
 0x379   : > { %1732 = vpow2.f32 %v1033_v14  ;;  %v1029_v16 = vmul.f32 1.442695, %v1012_v15 }
 0x37a   : > { %v992_v17 = vpop.xlane.xlu0 %991 }
 0x37b   : > { %v1017_v18 = vsub.f32 %v969_v39, %v992_v17  ;;  %1734 = vpow2.f32 %v1029_v16 }
 0x37c   : > { %v994_v19 = vpop.xlane.xlu1 %993 }
 0x37d   : > { %v1039_v20 = vmul.f32 1.442695, %v1017_v18  ;;  %v1018_v21 = vsub.f32 %v970_v42, %v994_v19 }
 0x37e   : > { %v988_v22 = vpop.xlane.xlu0 %987 }
 0x37f   : > { %1736 = vpow2.f32 %v1039_v20  ;;  %v1041_v23 = vmul.f32 1.442695, %v1018_v21  ;;  %v1015_v24 = vsub.f32 %v967_v45, %v988_v22 }
 0x380   : > { %v990_v25 = vpop.xlane.xlu1 %989 }
 0x381   : > { %1738 = vpow2.f32 %v1041_v23  ;;  %v1035_v26 = vmul.f32 1.442695, %v1015_v24  ;;  %v1016_v27 = vsub.f32 %v2236_v47, %v990_v25 }
 0x382   : > { %v2282_v28 = vpop.eup %1728  ;;  %v1000_v29 = vpop.xlane.xlu0 %999 }
 0x383   : > { %1740 = vpow2.f32 %v1035_v26  ;;  %v1037_v30 = vmul.f32 1.442695, %v1016_v27  ;;  %v1021_v31 = vsub.f32 %v2241_v51, %v1000_v29  ;;  %1063 = vadd.xlane.f32.xlu0 %v2282_v28 }
 0x384   : > { %v1002_v32 = vpop.xlane.xlu1 %1001  ;;  %v2286_v33 = vpop.eup %1730 }
 0x385   : > { %1742 = vpow2.f32 %v1037_v30  ;;  %v1047_v34 = vmul.f32 1.442695, %v1021_v31  ;;  %v1022_v35 = vsub.f32 %v2246_v54, %v1002_v32 }
 0x386   : > { %v2289_v36 = vpop.eup %1732  ;;  %v996_v37 = vpop.xlane.xlu0 %995 }
 0x387   : > { %1744 = vpow2.f32 %v1047_v34  ;;  %v1049_v38 = vmul.f32 1.442695, %v1022_v35  ;;  %v1019_v39 = vsub.f32 %v2251_v56, %v996_v37  ;;  %1065 = vadd.xlane.f32.xlu1 %v2289_v36  ;;  %1059 = vadd.xlane.f32.xlu0 %v2286_v33 }
 0x388   : > { %v998_v40 = vpop.xlane.xlu1 %997  ;;  %v2295_v43 = vpop.eup %1734 }
 0x389   : > { %1746 = vpow2.f32 %v1049_v38  ;;  %v1043_v41 = vmul.f32 1.442695, %v1019_v39  ;;  %v1020_v42 = vsub.f32 %v2256_v59, %v998_v40 }
 0x38a   : > { %v1004_v44 = vpop.xlane.xlu0 %1003 }
 0x38b   : > { %1748 = vpow2.f32 %v1043_v41  ;;  %v1045_v45 = vmul.f32 1.442695, %v1020_v42  ;;  %v1023_v46 = vsub.f32 %v2261_v62, %v1004_v44  ;;  %1061 = vadd.xlane.f32.xlu1 %v2295_v43 }
 0x38c   : > { %v2299_v47 = vpop.eup %1736 }
 0x38d   : > { %1750 = vpow2.f32 %v1045_v45  ;;  %v1051_v48 = vmul.f32 1.442695, %v1023_v46  ;;  %1071 = vadd.xlane.f32.xlu0 %v2299_v47 }
 0x38e   : > { %v2302_v49 = vpop.eup %1738  ;;  %v1006_v50 = vpop.xlane.xlu1 %1005 }
 0x38f   : > { %v1008_v51 = vpop.xlane.xlu0 %1007  ;;  %1752 = vpow2.f32 %v1051_v48  ;;  %v1024_v52 = vsub.f32 %v2266_v2, %v1006_v50  ;;  %1073 = vadd.xlane.f32.xlu1 %v2302_v49 }
 0x390   : > { %v1025_v53 = vsub.f32 %v2270_v3, %v1008_v51  ;;  %v2307_v54 = vpop.eup %1740 }
 0x391   : > { %v1053_v55 = vmul.f32 1.442695, %v1024_v52  ;;  %1067 = vadd.xlane.f32.xlu0 %v2307_v54 }
 0x392   : > { %v1055_v56 = vmul.f32 1.442695, %v1025_v53  ;;  %v2310_v57 = vpop.eup %1742  ;;  %v1010_v58 = vpop.xlane.xlu1 %1009 }
 0x393   : > { %1754 = vpow2.f32 %v1053_v55  ;;  %v1026_v59 = vsub.f32 %v2276_v4, %v1010_v58  ;;  %1069 = vadd.xlane.f32.xlu1 %v2310_v57 }
 0x394   : > { %v2314_v60 = vpop.eup %1744  ;;  %1756 = vpow2.f32 %v1055_v56 }
 0x395   : > { %v1057_v61 = vmul.f32 1.442695, %v1026_v59  ;;  %1079 = vadd.xlane.f32.xlu0 %v2314_v60 }
 0x396   : > { %v2317_v62 = vpop.eup %1746 }
 0x397   : > { %1758 = vpow2.f32 %v1057_v61  ;;  %1081 = vadd.xlane.f32.xlu1 %v2317_v62 }
 0x398   : > { %v2320_v63 = vpop.eup %1748 }
 0x399   : > { %1075 = vadd.xlane.f32.xlu0 %v2320_v63 }
 0x39a   : > { %v2323_v0 = vpop.eup %1750 }
 0x39b   : > { %1077 = vadd.xlane.f32.xlu1 %v2323_v0 }
 0x39c   : > { %v2326_v1 = vpop.eup %1752 }
 0x39d   : > { %1083 = vadd.xlane.f32.xlu0 %v2326_v1 }
 0x3a0   : > { %v2329_v2 = vpop.eup %1754 }
 0x3a1   : > { %v2331_v3 = vpop.eup %1756  ;;  %1085 = vadd.xlane.f32.xlu1 %v2329_v2 }
 0x3a2   : > { %1087 = vadd.xlane.f32.xlu0 %v2331_v3 }
 0x3a4   : > { %v2335_v4 = vpop.eup %1758 }
 0x3a5   : > { %1089 = vadd.xlane.f32.xlu1 %v2335_v4 }
 0x40c   : > { %v1064_v5 = vpop.xlane.xlu0 %1063 }
 0x40d   : > { %1760 = vrcp.f32 %v1064_v5 }
 0x410   : > { %v1066_v6 = vpop.xlane.xlu1 %1065  ;;  %v1060_v7 = vpop.xlane.xlu0 %1059 }
 0x411   : > { %1762 = vrcp.f32 %v1066_v6 }
 0x412   : > { %1764 = vrcp.f32 %v1060_v7 }
 0x414   : > { %v1062_v8 = vpop.xlane.xlu1 %1061 }
 0x415   : > { %1766 = vrcp.f32 %v1062_v8 }
 0x416   : > { %v1072_v9 = vpop.xlane.xlu0 %1071 }
 0x417   : > { %1768 = vrcp.f32 %v1072_v9 }
 0x418   : > { %v1074_v10 = vpop.xlane.xlu1 %1073 }
 0x419   : > { %1770 = vrcp.f32 %v1074_v10 }
 0x41a   : > { %v1068_v11 = vpop.xlane.xlu0 %1067  ;;  %v1761_v12 = vpop.eup %1760 }
 0x41b   : > { %1772 = vrcp.f32 %v1068_v11  ;;  %v1096_v16 = vmul.f32 %v1761_v12, %v2282_v28 }
 0x41c   : > { %v1070_v13 = vpop.xlane.xlu1 %1069 }
 0x41d   : > { %1774 = vrcp.f32 %v1070_v13 }
 0x41e   : > { %v1763_v14 = vpop.eup %1762  ;;  %v1080_v15 = vpop.xlane.xlu0 %1079 }
 0x41f   : > { %v1098_v17 = vmul.f32 %v1763_v14, %v2289_v36  ;;  %1776 = vrcp.f32 %v1080_v15  ;;  %v1765_v18 = vpop.eup %1764 }
 0x420   : > { %v1082_v19 = vpop.xlane.xlu1 %1081  ;;  %v1092_v23 = vmul.f32 %v1765_v18, %v2286_v33 }
 0x421   : > { %v1416_v20 = vpack.c.bf16 %v1098_v17, %v1096_v16  ;;  %1778 = vrcp.f32 %v1082_v19 }
 0x422   : > { %v1767_v21 = vpop.eup %1766  ;;  %v1076_v22 = vpop.xlane.xlu0 %1075 }
 0x423   : > { %1448 = vst [vmem:[%s2342_s11 + $0x8] sm:$0xff] %v1416_v20   ;;  %v1094_v24 = vmul.f32 %v1767_v21, %v2295_v43  ;;  %1780 = vrcp.f32 %v1076_v22 }
 0x424   : > { %v1769_v25 = vpop.eup %1768  ;;  %v1078_v26 = vpop.xlane.xlu1 %1077 }
 0x425   : > { %v1411_v27 = vpack.c.bf16 %v1094_v24, %v1092_v23  ;;  %1782 = vrcp.f32 %v1078_v26  ;;  %v1104_v30 = vmul.f32 %v1769_v25, %v2299_v47 }
 0x426   : > { %v1771_v28 = vpop.eup %1770  ;;  %v1084_v29 = vpop.xlane.xlu0 %1083 }
 0x427   : > { %1412 = vst [vmem:[%s2342_s11] sm:$0xff] %v1411_v27   ;;  %v1106_v31 = vmul.f32 %v1771_v28, %v2302_v49  ;;  %1784 = vrcp.f32 %v1084_v29 }
 0x428   : > { %v1773_v32 = vpop.eup %1772 }
 0x429   : > { %v1426_v34 = vpack.c.bf16 %v1106_v31, %v1104_v30  ;;  %v1100_v36 = vmul.f32 %v1773_v32, %v2307_v54 }
 0x42a   : > { %v1775_v33 = vpop.eup %1774  ;;  %v1086_v35 = vpop.xlane.xlu1 %1085 }
 0x42b   : > { %1450 = vst [vmem:[%s2342_s11 + $0x18] sm:$0xff] %v1426_v34   ;;  %v1102_v37 = vmul.f32 %v1775_v33, %v2310_v57  ;;  %1786 = vrcp.f32 %v1086_v35  ;;  %v1088_v38 = vpop.xlane.xlu0 %1087 }
 0x42c   : > { %v1777_v39 = vpop.eup %1776  ;;  %1788 = vrcp.f32 %v1088_v38 }
 0x42d   : > { %v1421_v40 = vpack.c.bf16 %v1102_v37, %v1100_v36  ;;  %v1112_v43 = vmul.f32 %v1777_v39, %v2314_v60 }
 0x42e   : > { %v1779_v41 = vpop.eup %1778  ;;  %v1090_v42 = vpop.xlane.xlu1 %1089 }
 0x42f   : > { %1449 = vst [vmem:[%s2342_s11 + $0x10] sm:$0xff] %v1421_v40   ;;  %v1114_v44 = vmul.f32 %v1779_v41, %v2317_v62  ;;  %1790 = vrcp.f32 %v1090_v42 }
 0x430   : > { %v1781_v45 = vpop.eup %1780 }
 0x431   : > { %v1436_v46 = vpack.c.bf16 %v1114_v44, %v1112_v43  ;;  %v1108_v48 = vmul.f32 %v1781_v45, %v2320_v63 }
 0x432   : > { %v1783_v47 = vpop.eup %1782 }
 0x433   : > { %1452 = vst [vmem:[%s2342_s11 + $0x28] sm:$0xff] %v1436_v46   ;;  %v1110_v49 = vmul.f32 %v1783_v47, %v2323_v0 }
 0x434   : > { %v1785_v51 = vpop.eup %1784 }
 0x435   : > { %v1431_v50 = vpack.c.bf16 %v1110_v49, %v1108_v48  ;;  %v1116_v53 = vmul.f32 %v1785_v51, %v2326_v1 }
 0x437   : > { %1451 = vst [vmem:[%s2342_s11 + $0x20] sm:$0xff] %v1431_v50  }
 0x438   : > { %v1787_v52 = vpop.eup %1786 }
 0x439   : > { %v1118_v54 = vmul.f32 %v1787_v52, %v2329_v2  ;;  %v1789_v55 = vpop.eup %1788 }
 0x43a   : > { %v1120_v58 = vmul.f32 %v1789_v55, %v2331_v3 }
 0x43b   : > { %v1441_v56 = vpack.c.bf16 %v1118_v54, %v1116_v53 }
 0x43c   : > { %v1791_v57 = vpop.eup %1790 }
 0x43d   : > { %1453 = vst [vmem:[%s2342_s11 + $0x30] sm:$0xff] %v1441_v56   ;;  %v1122_v59 = vmul.f32 %v1791_v57, %v2335_v4 }
 0x43f   : > { %v1446_v60 = vpack.c.bf16 %v1122_v59, %v1120_v58 }
 0x441   : > { %1454 = vst [vmem:[%s2342_s11 + $0x38] sm:$0xff] %v1446_v60  }
 0x442   : > { %1911 = shalt.err (!%p1908_p10)
}
 0x443   : > { %s1912_s10 = scalar_lea.hbm %s2370_s1, 1024  ;;  %s1916_s29 = scalar_lea.hbm %s2423_s7, 2048 }
 0x444   : > { %p1913_p6 = scmp.ne.s32.totalorder %s2370_s1, %s1912_s10  ;;  %p1917_p3 = scmp.lt.s32.totalorder %s2370_s1, %s2423_s7 }
 0x445   : > { %p1918_p11 = scmp.lt.s32.totalorder %s1916_s29, %s1912_s10 }
 0x446   : > { %p1914_p4 = pnand %p1913_p6, %p2446_p1 }
 0x447   : > { %p1919_p5 = por %p1918_p11, %p1917_p3 }
 0x448   : > { %p1915_p8 = pneg %p1914_p4 }
 0x44a   : > { %p1920_p7 = pnand %p1919_p5, %p1915_p8 }
 0x44c   : > { %1923 = shalt.err (!%p1920_p7)
}
 0x44d   : > { %s1979_s18 = smov 64   ;;  %s1980_s23 = smov 4  }
 0x44e   : > { %1629 = dma.vmem_to_hbm [thread:$0]  (%p2446_p1), %s2372_s22, 1024, %s2370_s1, %s1204_s28, %s1979_s18, %s1979_s18, %s1980_s23  }
 0x44f PF: > { %s1232_s16 = sand.u32 1, %s1958_s24   ;;  %p2447_p12 = scmp.ne.s32.totalorder %s2432_s8, 0 }
 0x450   : > { %p2448_p9 = scmp.ge.s32.totalorder %s1970_s27, 2  ;;  %s1233_s12 = scalar_lea.sflag [#allocation4], %s1232_s16 }
 0x452   : > { %p1646_p13 = pnand %p2448_p9, %p2447_p12 }
 0x454   : > { %p1647_p0 = pneg %p1646_p13 }
 0x456   : > { %1953 = dma.done.wait (%p1647_p0), %s1233_s12, 1024  }
 0x457   : > { %1955 = vsyncadd (%p1647_p0), %s1233_s12, 4294966272  ;;  %p22_p2 = scmp.ge.s32.totalorder %s2110_s14, 4   ;;  %s2449_s24 = smov %s1962_s25 }
 0x458   : > { %s2450_s25 = smov %s1966_s26  ;;  %s2451_s26 = smov %s2120_s17 }
 0x459   : > { %s2452_s27 = smov %s2110_s14  ;;  %24 = sbr.rel (!%p22_p2) target bundleno = 9 (0x9), region = 105 }
 0x45e   :  { %1238 = vsyncpa [#allocation3], 1 }
 0x45f   :  { %1240 = vsyncpa [#allocation3 + $0x1], 1 }
 0x460   :  { %1241 = vsyncpa [#allocation6], 1 }
 0x461   :  { %1242 = vsyncpa [#allocation9], 1 }
 0x462   :  { %1243 = vsyncpa [#allocation4], 1 }
 0x463   :  { %1245 = vsyncpa [#allocation4 + $0x1], 1 }

</bundles_post_ra>
